<compile_context>
chip_gen: v7x
topology: tpu7x:2x2x1
jax: 0.10.0
libtpu: 0.0.40
codegen_flags: <defaults>
</compile_context>

<pallas_src>
import functools
import math

import jax
import jax.numpy as jnp
import numpy as np
from jax.experimental import pallas as pl
from jax.experimental.pallas import tpu as pltpu


def _cluster_loss_kernel(ci_ref, cj_ref, e_ref, bm_ref, o_ref,
                         aii_ref, aij_ref, ajj_ref, si_ref, sj_ref,
                         *, class_num, temperature, bf_total, has_tail):
    step = pl.program_id(0)
    nsteps = pl.num_programs(0)

    @pl.when(step == 0)
    def _init():
        aii_ref[...] = jnp.zeros_like(aii_ref)
        aij_ref[...] = jnp.zeros_like(aij_ref)
        ajj_ref[...] = jnp.zeros_like(ajj_ref)
        si_ref[...] = jnp.zeros_like(si_ref)
        sj_ref[...] = jnp.zeros_like(sj_ref)

    nt = (((0,), (0,)), ((), ()))  # contract over the (folded) batch axis: x^T y

    def accumulate(xi, xj):
        # Column sums (entropy term) + fold-Gram blocks (MXU, f32 accumulation).
        si_ref[...] += jnp.sum(xi.astype(jnp.float32), axis=0, keepdims=True)
        sj_ref[...] += jnp.sum(xj.astype(jnp.float32), axis=0, keepdims=True)
        aii_ref[...] += jax.lax.dot_general(xi, xi, nt, preferred_element_type=jnp.float32)
        aij_ref[...] += jax.lax.dot_general(xi, xj, nt, preferred_element_type=jnp.float32)
        ajj_ref[...] += jax.lax.dot_general(xj, xj, nt, preferred_element_type=jnp.float32)

    xi = ci_ref[...]
    xj = cj_ref[...]
    tb, f = xi.shape

    if has_tail:
        # Only the final grid step can contain padded rows: interior steps run
        # completely unmasked (perf feedback), the tail masks folded rows >= B/r.
        @pl.when(step != nsteps - 1)
        def _interior():
            accumulate(xi, xj)

        @pl.when(step == nsteps - 1)
        def _tail():
            row = jax.lax.broadcasted_iota(jnp.int32, (tb, f), 0) + step * tb
            valid = row < bf_total
            zero = jnp.zeros((), xi.dtype)
            accumulate(jnp.where(valid, xi, zero), jnp.where(valid, xj, zero))
    else:
        accumulate(xi, xj)

    @pl.when(step == nsteps - 1)
    def _finalize():
        kk = class_num
        inv_t = jnp.float32(1.0 / temperature)
        min_norm = jnp.float32(1e-4)   # sqrt(eps), eps = 1e-8 in the torch code
        neg_big = jnp.float32(-1e30)

        e_mat = e_ref[...]    # (F, K) f32, E[p*K+a, b] = (a == b)
        bmask = bm_ref[...]   # (F, F) f32 block-diagonal 0/1 mask

        def block_diag_sum(a):
            # sum of the r diagonal K x K blocks of the (F, F) fold-Gram:
            #   E^T (mask * A) E
            masked = a * bmask
            tmp = jax.lax.dot_general(e_mat, masked, (((0,), (0,)), ((), ())),
                                      preferred_element_type=jnp.float32)      # (K, F)
            return jax.lax.dot_general(tmp, e_mat, (((1,), (0,)), ((), ())),
                                       preferred_element_type=jnp.float32)     # (K, K)

        gii = block_diag_sum(aii_ref[...])
        gij = block_diag_sum(aij_ref[...])
        gjj = block_diag_sum(ajj_ref[...])
        si = jax.lax.dot_general(si_ref[...], e_mat, (((1,), (0,)), ((), ())),
                                 preferred_element_type=jnp.float32)           # (1, K)
        sj = jax.lax.dot_general(sj_ref[...], e_mat, (((1,), (0,)), ((), ())),
                                 preferred_element_type=jnp.float32)           # (1, K)

        rid = jax.lax.broadcasted_iota(jnp.int32, (kk, kk), 0)
        cid = jax.lax.broadcasted_iota(jnp.int32, (kk, kk), 1)
        eye = rid == cid

        # Row norms of c = [c_i^T ; c_j^T] come from the Gram diagonals.
        dii = jnp.where(eye, gii, 0.0)
        djj = jnp.where(eye, gjj, 0.0)
        ni_col = jnp.maximum(jnp.sqrt(jnp.sum(dii, axis=1, keepdims=True)), min_norm)
        ni_row = jnp.maximum(jnp.sqrt(jnp.sum(dii, axis=0, keepdims=True)), min_norm)
        nj_col = jnp.maximum(jnp.sqrt(jnp.sum(djj, axis=1, keepdims=True)), min_norm)
        nj_row = jnp.maximum(jnp.sqrt(jnp.sum(djj, axis=0, keepdims=True)), min_norm)

        sii = gii * inv_t / (ni_col * ni_row)
        sjj = gjj * inv_t / (nj_col * nj_row)
        sij = gij * inv_t / (ni_col * nj_row)

        # Exclude self-similarity (the diagonal of the full 2K x 2K sim matrix).
        sii_m = jnp.where(eye, neg_big, sii)
        sjj_m = jnp.where(eye, neg_big, sjj)

        # Rows 0..K-1 (clusters of c_i): reduce along lanes (axis=1).
        m_top = jnp.maximum(jnp.max(sii_m, axis=1, keepdims=True),
                            jnp.max(sij, axis=1, keepdims=True))
        lse_top = m_top + jnp.log(
            jnp.sum(jnp.exp(sii_m - m_top), axis=1, keepdims=True)
            + jnp.sum(jnp.exp(sij - m_top), axis=1, keepdims=True))

        # Rows K..2K-1 (clusters of c_j): Sji == Sij^T and Sjj is symmetric, so
        # per-row reductions become axis-0 reductions (no transposes needed).
        m_bot = jnp.maximum(jnp.max(sjj_m, axis=0, keepdims=True),
                            jnp.max(sij, axis=0, keepdims=True))
        lse_bot = m_bot + jnp.log(
            jnp.sum(jnp.exp(sjj_m - m_bot), axis=0, keepdims=True)
            + jnp.sum(jnp.exp(sij - m_bot), axis=0, keepdims=True))

        # Positives are sim[a, K+a] and sim[K+a, a], i.e. diag(Sij) twice.
        pos_sum = 2.0 * jnp.sum(jnp.where(eye, sij, 0.0), keepdims=True)
        n_total = jnp.float32(2 * kk)
        ce = (jnp.sum(lse_top, axis=0, keepdims=True)
              + jnp.sum(lse_bot, axis=1, keepdims=True)
              - pos_sum) / n_total

        # Entropy regularizer (p*log(p) guarded against p == 0).
        p_i = si / jnp.sum(si, keepdims=True)
        p_j = sj / jnp.sum(sj, keepdims=True)
        log_k = jnp.float32(math.log(kk))
        ne_i = log_k + jnp.sum(p_i * jnp.log(jnp.where(p_i > 0, p_i, 1.0)), keepdims=True)
        ne_j = log_k + jnp.sum(p_j * jnp.log(jnp.where(p_j > 0, p_j, 1.0)), keepdims=True)

        o_ref[...] = ce + ne_i + ne_j


def _fold_factor(batch, class_num, max_lanes=128):
    """Largest power-of-two r with r | batch and r*class_num <= max_lanes."""
    r, cand = 1, 2
    while cand * class_num <= max_lanes and batch % cand == 0:
        r = cand
        cand *= 2
    return r


def _vmem_plan():
    """(per-input-buffer target bytes, vmem_limit_bytes), conservative fallback."""
    try:
        info = pltpu.get_tpu_info()
        cap = getattr(info, "vmem_capacity_bytes", 0) or 0
        if cap >= 96 * 1024 * 1024:                      # v5e / v6e: 128 MiB VMEM
            return 8 * 1024 * 1024, 64 * 1024 * 1024
    except Exception:
        pass
    return 4 * 1024 * 1024, 28 * 1024 * 1024             # v7x-safe (64 MiB VMEM) / unknown


def cluster_loss(c_i, c_j, *, class_num, temperature, tile_rows=None):
    """JAX/Pallas equivalent of ClusterLoss.forward(c_i, c_j).

    `tile_rows` (optional) is expressed in rows of the lane-folded [B/r, r*K] view.
    Passing bf16 c_i / c_j halves HBM traffic (f32 accumulation is kept on-chip).
    """
    b, k = c_i.shape
    assert c_j.shape == (b, k) and k == class_num

    # Free lane-densifying reshape: fold r batch rows into lanes.
    r = _fold_factor(b, k)
    f = r * k
    bf = b // r
    ci_f = c_i.reshape(bf, f)
    cj_f = c_j.reshape(bf, f)

    # --- VMEM-accurate tile sizing (rows are lane-padded to >=128 lanes). ---
    itemsize = jnp.dtype(c_i.dtype).itemsize
    row_bytes = max(f, 128) * itemsize
    per_buf_target, vmem_limit = _vmem_plan()
    scratch_bytes = 3 * f * f * 4 + 2 * f * 4 + 4096
    const_bytes = 2 * (f * k + f * f) * 4                # E + mask, double-buffered
    budget = max(vmem_limit - scratch_bytes - const_bytes - (4 << 20), 1 << 20)
    per_buf = min(per_buf_target, budget // 4)           # 2 inputs x 2 pipeline buffers

    if tile_rows is None:
        tb = max(8, (per_buf // row_bytes) // 8 * 8)
    else:
        tb = max(8, (int(tile_rows) // 8) * 8)
    if bf <= tb:
        tb = bf                                          # single full-extent block
    grid = (pl.cdiv(bf, tb),)
    has_tail = (bf % tb) != 0

    # Host-built constants for recovering the K x K Grams from the fold-Gram.
    e_mat = jnp.asarray(np.tile(np.eye(k, dtype=np.float32), (r, 1)))                 # (F, K)
    bmask = jnp.asarray(np.kron(np.eye(r, dtype=np.float32),
                                np.ones((k, k), dtype=np.float32)))                   # (F, F)

    kernel = functools.partial(
        _cluster_loss_kernel,
        class_num=k, temperature=float(temperature), bf_total=bf, has_tail=has_tail)

    out = pl.pallas_call(
        kernel,
        out_shape=jax.ShapeDtypeStruct((1, 1), jnp.float32),
        grid_spec=pltpu.PrefetchScalarGridSpec(
            num_scalar_prefetch=0,
            grid=grid,
            in_specs=[pl.BlockSpec((tb, f), lambda i: (i, 0)),
                      pl.BlockSpec((tb, f), lambda i: (i, 0)),
                      pl.BlockSpec((f, k), lambda i: (0, 0)),
                      pl.BlockSpec((f, f), lambda i: (0, 0))],
            out_specs=pl.BlockSpec((1, 1), lambda i: (0, 0)),
            scratch_shapes=[pltpu.VMEM((f, f), jnp.float32),   # fold-Gram ii
                            pltpu.VMEM((f, f), jnp.float32),   # fold-Gram ij
                            pltpu.VMEM((f, f), jnp.float32),   # fold-Gram jj
                            pltpu.VMEM((1, f), jnp.float32),   # folded colsum c_i
                            pltpu.VMEM((1, f), jnp.float32)],  # folded colsum c_j
        ),
        compiler_params=pltpu.CompilerParams(
            dimension_semantics=("arbitrary",),   # resident accumulators across the grid
            vmem_limit_bytes=int(vmem_limit),
        ),
    )(ci_f, cj_f, e_mat, bmask)
    return out[0, 0]


def _reference(c_i, c_j, class_num, temperature):
    """Pure-JAX/numpy literal port of the PyTorch module for validation."""
    K = class_num
    N = 2 * K
    eps = 1e-8
    c_i = c_i.astype(jnp.float32)
    c_j = c_j.astype(jnp.float32)

    p_i = c_i.sum(0).reshape(-1)
    p_i = p_i / p_i.sum()
    ne_i = math.log(K) + (p_i * jnp.log(p_i)).sum()
    p_j = c_j.sum(0).reshape(-1)
    p_j = p_j / p_j.sum()
    ne_j = math.log(K) + (p_j * jnp.log(p_j)).sum()
    ne_loss = ne_i + ne_j

    c = jnp.concatenate([c_i.T, c_j.T], axis=0)                   # [N, B]
    t1 = c[:, None, :]
    t2 = c[None, :, :]
    t1_div = jnp.maximum(jnp.linalg.norm(t1, axis=2, keepdims=True), math.sqrt(eps))
    t2_div = jnp.maximum(jnp.linalg.norm(t2, axis=2, keepdims=True), math.sqrt(eps))
    sim = ((t1 / t1_div) * (t2 / t2_div)).sum(axis=2) / temperature  # [N, N]

    sim_i_j = jnp.diagonal(sim, offset=K)
    sim_j_i = jnp.diagonal(sim, offset=-K)
    positive = jnp.concatenate([sim_i_j, sim_j_i]).reshape(N, 1)

    mask = np.ones((N, N), dtype=bool)
    np.fill_diagonal(mask, False)
    for t in range(K):
        mask[t, K + t] = False
        mask[K + t, t] = False
    negative = jnp.asarray(np.asarray(sim)[mask].reshape(N, -1))

    logits = jnp.concatenate([positive, negative], axis=1)
    lse = jax.scipy.special.logsumexp(logits, axis=1)
    loss = jnp.sum(lse - logits[:, 0]) / N                         # CE(sum) with label 0, /N
    return loss + ne_loss


if __name__ == "__main__":
    key = jax.random.PRNGKey(0)
    k1, k2, k3, k4 = jax.random.split(key, 4)

    # Case 1: small shapes typical of the module (soft cluster assignments).
    batch, class_num, temperature = 64, 16, 0.5
    c_i = jax.nn.softmax(jax.random.normal(k1, (batch, class_num), jnp.float32), axis=-1)
    c_j = jax.nn.softmax(jax.random.normal(k2, (batch, class_num), jnp.float32), axis=-1)
    out = cluster_loss(c_i, c_j, class_num=class_num, temperature=temperature)
    jax.block_until_ready(out)
    ref = _reference(c_i, c_j, class_num, temperature)
    assert out.shape == ()
    assert jnp.allclose(out, ref, rtol=5e-4, atol=5e-4), (out, ref)

    # Case 2: folded batch not a multiple of the tile -> exercises the pl.when-
    # gated tail masking and multi-step accumulator residency.
    batch2 = 1000
    c_i2 = jax.nn.softmax(jax.random.normal(k3, (batch2, class_num), jnp.float32), axis=-1)
    c_j2 = jax.nn.softmax(jax.random.normal(k4, (batch2, class_num), jnp.float32), axis=-1)
    out2 = cluster_loss(c_i2, c_j2, class_num=class_num, temperature=temperature,
                        tile_rows=48)
    jax.block_until_ready(out2)
    ref2 = _reference(c_i2, c_j2, class_num, temperature)
    assert jnp.allclose(out2, ref2, rtol=5e-4, atol=5e-4), (out2, ref2)

    print("KERNEL_OK")
</pallas_src>

<mosaic_0001>
module attributes {stable_mosaic.version = 11 : i64} {
  func.func @_cluster_loss_kernel(%arg0: i32, %arg1: memref<8x128xf32, #tpu.memory_space<vmem>>, %arg2: memref<8x128xf32, #tpu.memory_space<vmem>>, %arg3: memref<128x16xf32, #tpu.memory_space<vmem>>, %arg4: memref<128x128xf32, #tpu.memory_space<vmem>>, %arg5: memref<1x1xf32, #tpu.memory_space<vmem>>, %arg6: memref<128x128xf32, #tpu.memory_space<vmem>>, %arg7: memref<128x128xf32, #tpu.memory_space<vmem>>, %arg8: memref<128x128xf32, #tpu.memory_space<vmem>>, %arg9: memref<1x128xf32, #tpu.memory_space<vmem>>, %arg10: memref<1x128xf32, #tpu.memory_space<vmem>>) attributes {dimension_semantics = [#tpu.dimension_semantics<arbitrary>], iteration_bounds = array<i64: 1>, scalar_prefetch = 0 : i64, scratch_operands = 5 : i64, tpu.core_type = #tpu.core_type<tc>, window_params = [{transform_indices = @transform_0, window_bounds = array<i64: 8, 128>}, {transform_indices = @transform_1, window_bounds = array<i64: 8, 128>}, {pipeline_mode = #tpu.pipeline_mode<synchronous>, transform_indices = @transform_2, window_bounds = array<i64: 128, 16>}, {pipeline_mode = #tpu.pipeline_mode<synchronous>, transform_indices = @transform_3, window_bounds = array<i64: 128, 128>}, {pipeline_mode = #tpu.pipeline_mode<synchronous>, transform_indices = @transform_4, window_bounds = array<i64: 1, 1>}]} {
    %c0_i32 = arith.constant 0 : i32
    %0 = arith.cmpi eq, %arg0, %c0_i32 : i32
    %1 = arith.extui %0 : i1 to i32
    %c0_i32_0 = arith.constant 0 : i32
    %2 = arith.cmpi ne, %1, %c0_i32_0 : i32
    scf.if %2 {
      %cst_30 = arith.constant 0.000000e+00 : f32
      %30 = vector.broadcast %cst_30 : f32 to vector<128x128xf32>
      %c0_31 = arith.constant 0 : index
      %c0_32 = arith.constant 0 : index
      %31 = vector.load %arg6[%c0_31, %c0_32] : memref<128x128xf32, #tpu.memory_space<vmem>>, vector<128x128xf32>
      tpu.vector_store %arg6[%c0_31, %c0_32], %30 {strides = array<i32>} : memref<128x128xf32, #tpu.memory_space<vmem>>, vector<128x128xf32>,
      %cst_33 = arith.constant 0.000000e+00 : f32
      %32 = vector.broadcast %cst_33 : f32 to vector<128x128xf32>
      %c0_34 = arith.constant 0 : index
      %c0_35 = arith.constant 0 : index
      %33 = vector.load %arg7[%c0_34, %c0_35] : memref<128x128xf32, #tpu.memory_space<vmem>>, vector<128x128xf32>
      tpu.vector_store %arg7[%c0_34, %c0_35], %32 {strides = array<i32>} : memref<128x128xf32, #tpu.memory_space<vmem>>, vector<128x128xf32>,
      %cst_36 = arith.constant 0.000000e+00 : f32
      %34 = vector.broadcast %cst_36 : f32 to vector<128x128xf32>
      %c0_37 = arith.constant 0 : index
      %c0_38 = arith.constant 0 : index
      %35 = vector.load %arg8[%c0_37, %c0_38] : memref<128x128xf32, #tpu.memory_space<vmem>>, vector<128x128xf32>
      tpu.vector_store %arg8[%c0_37, %c0_38], %34 {strides = array<i32>} : memref<128x128xf32, #tpu.memory_space<vmem>>, vector<128x128xf32>,
      %cst_39 = arith.constant 0.000000e+00 : f32
      %36 = vector.broadcast %cst_39 : f32 to vector<1x128xf32>
      %c0_40 = arith.constant 0 : index
      %c0_41 = arith.constant 0 : index
      %37 = vector.load %arg9[%c0_40, %c0_41] : memref<1x128xf32, #tpu.memory_space<vmem>>, vector<1x128xf32>
      tpu.vector_store %arg9[%c0_40, %c0_41], %36 {strides = array<i32>} : memref<1x128xf32, #tpu.memory_space<vmem>>, vector<1x128xf32>,
      %cst_42 = arith.constant 0.000000e+00 : f32
      %38 = vector.broadcast %cst_42 : f32 to vector<1x128xf32>
      %c0_43 = arith.constant 0 : index
      %c0_44 = arith.constant 0 : index
      %39 = vector.load %arg10[%c0_43, %c0_44] : memref<1x128xf32, #tpu.memory_space<vmem>>, vector<1x128xf32>
      tpu.vector_store %arg10[%c0_43, %c0_44], %38 {strides = array<i32>} : memref<1x128xf32, #tpu.memory_space<vmem>>, vector<1x128xf32>,
    } else {
    }
    %c0 = arith.constant 0 : index
    %c0_1 = arith.constant 0 : index
    %3 = vector.load %arg1[%c0, %c0_1] : memref<8x128xf32, #tpu.memory_space<vmem>>, vector<8x128xf32>
    %c0_2 = arith.constant 0 : index
    %c0_3 = arith.constant 0 : index
    %4 = vector.load %arg2[%c0_2, %c0_3] : memref<8x128xf32, #tpu.memory_space<vmem>>, vector<8x128xf32>
    %c0_4 = arith.constant 0 : index
    %c0_5 = arith.constant 0 : index
    %5 = vector.load %arg9[%c0_4, %c0_5] : memref<1x128xf32, #tpu.memory_space<vmem>>, vector<1x128xf32>
    %cst = arith.constant dense<0.000000e+00> : vector<128xf32>
    %6 = vector.multi_reduction <add>, %3, %cst [0] : vector<8x128xf32> to vector<128xf32>
    %7 = vector.shape_cast %6 : vector<128xf32> to vector<1x128xf32>
    %8 = arith.addf %5, %7 : vector<1x128xf32>
    %c0_6 = arith.constant 0 : index
    %c0_7 = arith.constant 0 : index
    %9 = vector.load %arg9[%c0_6, %c0_7] : memref<1x128xf32, #tpu.memory_space<vmem>>, vector<1x128xf32>
    tpu.vector_store %arg9[%c0_6, %c0_7], %8 {strides = array<i32>} : memref<1x128xf32, #tpu.memory_space<vmem>>, vector<1x128xf32>,
    %c0_8 = arith.constant 0 : index
    %c0_9 = arith.constant 0 : index
    %10 = vector.load %arg10[%c0_8, %c0_9] : memref<1x128xf32, #tpu.memory_space<vmem>>, vector<1x128xf32>
    %cst_10 = arith.constant dense<0.000000e+00> : vector<128xf32>
    %11 = vector.multi_reduction <add>, %4, %cst_10 [0] : vector<8x128xf32> to vector<128xf32>
    %12 = vector.shape_cast %11 : vector<128xf32> to vector<1x128xf32>
    %13 = arith.addf %10, %12 : vector<1x128xf32>
    %c0_11 = arith.constant 0 : index
    %c0_12 = arith.constant 0 : index
    %14 = vector.load %arg10[%c0_11, %c0_12] : memref<1x128xf32, #tpu.memory_space<vmem>>, vector<1x128xf32>
    tpu.vector_store %arg10[%c0_11, %c0_12], %13 {strides = array<i32>} : memref<1x128xf32, #tpu.memory_space<vmem>>, vector<1x128xf32>,
    %c0_13 = arith.constant 0 : index
    %c0_14 = arith.constant 0 : index
    %15 = vector.load %arg6[%c0_13, %c0_14] : memref<128x128xf32, #tpu.memory_space<vmem>>, vector<128x128xf32>
    %cst_15 = arith.constant dense<0.000000e+00> : vector<128x128xf32>
    %16 = tpu.matmul %3, %3, %cst_15 {dimension_numbers = #tpu.dot_dimension_numbers<[0], [0], [1], [1], [0, 1, 1, 1], [], []>} : vector<8x128xf32>, vector<8x128xf32>, vector<128x128xf32> -> vector<128x128xf32>
    %17 = arith.addf %15, %16 : vector<128x128xf32>
    %c0_16 = arith.constant 0 : index
    %c0_17 = arith.constant 0 : index
    %18 = vector.load %arg6[%c0_16, %c0_17] : memref<128x128xf32, #tpu.memory_space<vmem>>, vector<128x128xf32>
    tpu.vector_store %arg6[%c0_16, %c0_17], %17 {strides = array<i32>} : memref<128x128xf32, #tpu.memory_space<vmem>>, vector<128x128xf32>,
    %c0_18 = arith.constant 0 : index
    %c0_19 = arith.constant 0 : index
    %19 = vector.load %arg7[%c0_18, %c0_19] : memref<128x128xf32, #tpu.memory_space<vmem>>, vector<128x128xf32>
    %cst_20 = arith.constant dense<0.000000e+00> : vector<128x128xf32>
    %20 = tpu.matmul %3, %4, %cst_20 {dimension_numbers = #tpu.dot_dimension_numbers<[0], [0], [1], [1], [0, 1, 1, 1], [], []>} : vector<8x128xf32>, vector<8x128xf32>, vector<128x128xf32> -> vector<128x128xf32>
    %21 = arith.addf %19, %20 : vector<128x128xf32>
    %c0_21 = arith.constant 0 : index
    %c0_22 = arith.constant 0 : index
    %22 = vector.load %arg7[%c0_21, %c0_22] : memref<128x128xf32, #tpu.memory_space<vmem>>, vector<128x128xf32>
    tpu.vector_store %arg7[%c0_21, %c0_22], %21 {strides = array<i32>} : memref<128x128xf32, #tpu.memory_space<vmem>>, vector<128x128xf32>,
    %c0_23 = arith.constant 0 : index
    %c0_24 = arith.constant 0 : index
    %23 = vector.load %arg8[%c0_23, %c0_24] : memref<128x128xf32, #tpu.memory_space<vmem>>, vector<128x128xf32>
    %cst_25 = arith.constant dense<0.000000e+00> : vector<128x128xf32>
    %24 = tpu.matmul %4, %4, %cst_25 {dimension_numbers = #tpu.dot_dimension_numbers<[0], [0], [1], [1], [0, 1, 1, 1], [], []>} : vector<8x128xf32>, vector<8x128xf32>, vector<128x128xf32> -> vector<128x128xf32>
    %25 = arith.addf %23, %24 : vector<128x128xf32>
    %c0_26 = arith.constant 0 : index
    %c0_27 = arith.constant 0 : index
    %26 = vector.load %arg8[%c0_26, %c0_27] : memref<128x128xf32, #tpu.memory_space<vmem>>, vector<128x128xf32>
    tpu.vector_store %arg8[%c0_26, %c0_27], %25 {strides = array<i32>} : memref<128x128xf32, #tpu.memory_space<vmem>>, vector<128x128xf32>,
    %c0_i32_28 = arith.constant 0 : i32
    %27 = arith.cmpi eq, %arg0, %c0_i32_28 : i32
    %28 = arith.extui %27 : i1 to i32
    %c0_i32_29 = arith.constant 0 : i32
    %29 = arith.cmpi ne, %28, %c0_i32_29 : i32
    scf.if %29 {
      %c0_30 = arith.constant 0 : index
      %c0_31 = arith.constant 0 : index
      %30 = vector.load %arg3[%c0_30, %c0_31] : memref<128x16xf32, #tpu.memory_space<vmem>>, vector<128x16xf32>
      %c0_32 = arith.constant 0 : index
      %c0_33 = arith.constant 0 : index
      %31 = vector.load %arg4[%c0_32, %c0_33] : memref<128x128xf32, #tpu.memory_space<vmem>>, vector<128x128xf32>
      %c0_34 = arith.constant 0 : index
      %c0_35 = arith.constant 0 : index
      %32 = vector.load %arg6[%c0_34, %c0_35] : memref<128x128xf32, #tpu.memory_space<vmem>>, vector<128x128xf32>
      %33 = arith.mulf %32, %31 : vector<128x128xf32>
      %cst_36 = arith.constant dense<0.000000e+00> : vector<16x128xf32>
      %34 = tpu.matmul %30, %33, %cst_36 {dimension_numbers = #tpu.dot_dimension_numbers<[0], [0], [1], [1], [0, 1, 1, 1], [], []>} : vector<128x16xf32>, vector<128x128xf32>, vector<16x128xf32> -> vector<16x128xf32>
      %cst_37 = arith.constant dense<0.000000e+00> : vector<16x16xf32>
      %35 = tpu.matmul %34, %30, %cst_37 {dimension_numbers = #tpu.dot_dimension_numbers<[1], [0], [0], [1], [0, 0, 1, 1], [], []>} : vector<16x128xf32>, vector<128x16xf32>, vector<16x16xf32> -> vector<16x16xf32>
      %c0_38 = arith.constant 0 : index
      %c0_39 = arith.constant 0 : index
      %36 = vector.load %arg7[%c0_38, %c0_39] : memref<128x128xf32, #tpu.memory_space<vmem>>, vector<128x128xf32>
      %37 = arith.mulf %36, %31 : vector<128x128xf32>
      %cst_40 = arith.constant dense<0.000000e+00> : vector<16x128xf32>
      %38 = tpu.matmul %30, %37, %cst_40 {dimension_numbers = #tpu.dot_dimension_numbers<[0], [0], [1], [1], [0, 1, 1, 1], [], []>} : vector<128x16xf32>, vector<128x128xf32>, vector<16x128xf32> -> vector<16x128xf32>
      %cst_41 = arith.constant dense<0.000000e+00> : vector<16x16xf32>
      %39 = tpu.matmul %38, %30, %cst_41 {dimension_numbers = #tpu.dot_dimension_numbers<[1], [0], [0], [1], [0, 0, 1, 1], [], []>} : vector<16x128xf32>, vector<128x16xf32>, vector<16x16xf32> -> vector<16x16xf32>
      %c0_42 = arith.constant 0 : index
      %c0_43 = arith.constant 0 : index
      %40 = vector.load %arg8[%c0_42, %c0_43] : memref<128x128xf32, #tpu.memory_space<vmem>>, vector<128x128xf32>
      %41 = arith.mulf %40, %31 : vector<128x128xf32>
      %cst_44 = arith.constant dense<0.000000e+00> : vector<16x128xf32>
      %42 = tpu.matmul %30, %41, %cst_44 {dimension_numbers = #tpu.dot_dimension_numbers<[0], [0], [1], [1], [0, 1, 1, 1], [], []>} : vector<128x16xf32>, vector<128x128xf32>, vector<16x128xf32> -> vector<16x128xf32>
      %cst_45 = arith.constant dense<0.000000e+00> : vector<16x16xf32>
      %43 = tpu.matmul %42, %30, %cst_45 {dimension_numbers = #tpu.dot_dimension_numbers<[1], [0], [0], [1], [0, 0, 1, 1], [], []>} : vector<16x128xf32>, vector<128x16xf32>, vector<16x16xf32> -> vector<16x16xf32>
      %c0_46 = arith.constant 0 : index
      %c0_47 = arith.constant 0 : index
      %44 = vector.load %arg9[%c0_46, %c0_47] : memref<1x128xf32, #tpu.memory_space<vmem>>, vector<1x128xf32>
      %cst_48 = arith.constant dense<0.000000e+00> : vector<1x16xf32>
      %45 = tpu.matmul %44, %30, %cst_48 {dimension_numbers = #tpu.dot_dimension_numbers<[1], [0], [0], [1], [0, 0, 1, 1], [], []>} : vector<1x128xf32>, vector<128x16xf32>, vector<1x16xf32> -> vector<1x16xf32>
      %c0_49 = arith.constant 0 : index
      %c0_50 = arith.constant 0 : index
      %46 = vector.load %arg10[%c0_49, %c0_50] : memref<1x128xf32, #tpu.memory_space<vmem>>, vector<1x128xf32>
      %cst_51 = arith.constant dense<0.000000e+00> : vector<1x16xf32>
      %47 = tpu.matmul %46, %30, %cst_51 {dimension_numbers = #tpu.dot_dimension_numbers<[1], [0], [0], [1], [0, 0, 1, 1], [], []>} : vector<1x128xf32>, vector<128x16xf32>, vector<1x16xf32> -> vector<1x16xf32>
      %48 = tpu.iota {dimensions = array<i32: 0>} : vector<16x16xi32>
      %49 = tpu.iota {dimensions = array<i32: 1>} : vector<16x16xi32>
      %50 = arith.cmpi eq, %48, %49 : vector<16x16xi32>
      %cst_52 = arith.constant 0.000000e+00 : f32
      %51 = vector.broadcast %cst_52 : f32 to vector<16x16xf32>
      %52 = arith.select %50, %35, %51 : vector<16x16xi1>, vector<16x16xf32>
      %cst_53 = arith.constant 0.000000e+00 : f32
      %53 = vector.broadcast %cst_53 : f32 to vector<16x16xf32>
      %54 = arith.select %50, %43, %53 : vector<16x16xi1>, vector<16x16xf32>
      %cst_54 = arith.constant dense<0.000000e+00> : vector<16xf32>
      %55 = vector.multi_reduction <add>, %52, %cst_54 [1] : vector<16x16xf32> to vector<16xf32>
      %56 = vector.shape_cast %55 : vector<16xf32> to vector<16x1xf32>
      %57 = math.sqrt %56 : vector<16x1xf32>
      %cst_55 = arith.constant 9.99999974E-5 : f32
      %58 = vector.broadcast %cst_55 : f32 to vector<16x1xf32>
      %59 = arith.maximumf %57, %58 : vector<16x1xf32>
      %cst_56 = arith.constant dense<0.000000e+00> : vector<16xf32>
      %60 = vector.multi_reduction <add>, %52, %cst_56 [0] : vector<16x16xf32> to vector<16xf32>
      %61 = vector.shape_cast %60 : vector<16xf32> to vector<1x16xf32>
      %62 = math.sqrt %61 : vector<1x16xf32>
      %cst_57 = arith.constant 9.99999974E-5 : f32
      %63 = vector.broadcast %cst_57 : f32 to vector<1x16xf32>
      %64 = arith.maximumf %62, %63 : vector<1x16xf32>
      %cst_58 = arith.constant dense<0.000000e+00> : vector<16xf32>
      %65 = vector.multi_reduction <add>, %54, %cst_58 [1] : vector<16x16xf32> to vector<16xf32>
      %66 = vector.shape_cast %65 : vector<16xf32> to vector<16x1xf32>
      %67 = math.sqrt %66 : vector<16x1xf32>
      %cst_59 = arith.constant 9.99999974E-5 : f32
      %68 = vector.broadcast %cst_59 : f32 to vector<16x1xf32>
      %69 = arith.maximumf %67, %68 : vector<16x1xf32>
      %cst_60 = arith.constant dense<0.000000e+00> : vector<16xf32>
      %70 = vector.multi_reduction <add>, %54, %cst_60 [0] : vector<16x16xf32> to vector<16xf32>
      %71 = vector.shape_cast %70 : vector<16xf32> to vector<1x16xf32>
      %72 = math.sqrt %71 : vector<1x16xf32>
      %cst_61 = arith.constant 9.99999974E-5 : f32
      %73 = vector.broadcast %cst_61 : f32 to vector<1x16xf32>
      %74 = arith.maximumf %72, %73 : vector<1x16xf32>
      %cst_62 = arith.constant 2.000000e+00 : f32
      %75 = vector.broadcast %cst_62 : f32 to vector<16x16xf32>
      %76 = arith.mulf %35, %75 : vector<16x16xf32>
      %77 = vector.broadcast %59 : vector<16x1xf32> to vector<16x16xf32>
      %78 = vector.broadcast %64 : vector<1x16xf32> to vector<16x16xf32>
      %79 = arith.mulf %77, %78 : vector<16x16xf32>
      %80 = arith.divf %76, %79 : vector<16x16xf32>
      %cst_63 = arith.constant 2.000000e+00 : f32
      %81 = vector.broadcast %cst_63 : f32 to vector<16x16xf32>
      %82 = arith.mulf %43, %81 : vector<16x16xf32>
      %83 = vector.broadcast %69 : vector<16x1xf32> to vector<16x16xf32>
      %84 = vector.broadcast %74 : vector<1x16xf32> to vector<16x16xf32>
      %85 = arith.mulf %83, %84 : vector<16x16xf32>
      %86 = arith.divf %82, %85 : vector<16x16xf32>
      %cst_64 = arith.constant 2.000000e+00 : f32
      %87 = vector.broadcast %cst_64 : f32 to vector<16x16xf32>
      %88 = arith.mulf %39, %87 : vector<16x16xf32>
      %89 = vector.broadcast %59 : vector<16x1xf32> to vector<16x16xf32>
      %90 = vector.broadcast %74 : vector<1x16xf32> to vector<16x16xf32>
      %91 = arith.mulf %89, %90 : vector<16x16xf32>
      %92 = arith.divf %88, %91 : vector<16x16xf32>
      %cst_65 = arith.constant -1.000000e+30 : f32
      %93 = vector.broadcast %cst_65 : f32 to vector<16x16xf32>
      %94 = arith.select %50, %93, %80 : vector<16x16xi1>, vector<16x16xf32>
      %cst_66 = arith.constant -1.000000e+30 : f32
      %95 = vector.broadcast %cst_66 : f32 to vector<16x16xf32>
      %96 = arith.select %50, %95, %86 : vector<16x16xi1>, vector<16x16xf32>
      %cst_67 = arith.constant dense<0xFF800000> : vector<16xf32>
      %97 = vector.multi_reduction <maximumf>, %94, %cst_67 [1] : vector<16x16xf32> to vector<16xf32>
      %98 = vector.shape_cast %97 : vector<16xf32> to vector<16x1xf32>
      %cst_68 = arith.constant dense<0xFF800000> : vector<16xf32>
      %99 = vector.multi_reduction <maximumf>, %92, %cst_68 [1] : vector<16x16xf32> to vector<16xf32>
      %100 = vector.shape_cast %99 : vector<16xf32> to vector<16x1xf32>
      %101 = arith.maximumf %98, %100 : vector<16x1xf32>
      %102 = vector.broadcast %101 : vector<16x1xf32> to vector<16x16xf32>
      %103 = arith.subf %94, %102 : vector<16x16xf32>
      %104 = math.exp %103 : vector<16x16xf32>
      %cst_69 = arith.constant dense<0.000000e+00> : vector<16xf32>
      %105 = vector.multi_reduction <add>, %104, %cst_69 [1] : vector<16x16xf32> to vector<16xf32>
      %106 = vector.shape_cast %105 : vector<16xf32> to vector<16x1xf32>
      %107 = vector.broadcast %101 : vector<16x1xf32> to vector<16x16xf32>
      %108 = arith.subf %92, %107 : vector<16x16xf32>
      %109 = math.exp %108 : vector<16x16xf32>
      %cst_70 = arith.constant dense<0.000000e+00> : vector<16xf32>
      %110 = vector.multi_reduction <add>, %109, %cst_70 [1] : vector<16x16xf32> to vector<16xf32>
      %111 = vector.shape_cast %110 : vector<16xf32> to vector<16x1xf32>
      %112 = arith.addf %106, %111 : vector<16x1xf32>
      %113 = math.log %112 : vector<16x1xf32>
      %114 = arith.addf %101, %113 : vector<16x1xf32>
      %cst_71 = arith.constant dense<0xFF800000> : vector<16xf32>
      %115 = vector.multi_reduction <maximumf>, %96, %cst_71 [0] : vector<16x16xf32> to vector<16xf32>
      %116 = vector.shape_cast %115 : vector<16xf32> to vector<1x16xf32>
      %cst_72 = arith.constant dense<0xFF800000> : vector<16xf32>
      %117 = vector.multi_reduction <maximumf>, %92, %cst_72 [0] : vector<16x16xf32> to vector<16xf32>
      %118 = vector.shape_cast %117 : vector<16xf32> to vector<1x16xf32>
      %119 = arith.maximumf %116, %118 : vector<1x16xf32>
      %120 = vector.broadcast %119 : vector<1x16xf32> to vector<16x16xf32>
      %121 = arith.subf %96, %120 : vector<16x16xf32>
      %122 = math.exp %121 : vector<16x16xf32>
      %cst_73 = arith.constant dense<0.000000e+00> : vector<16xf32>
      %123 = vector.multi_reduction <add>, %122, %cst_73 [0] : vector<16x16xf32> to vector<16xf32>
      %124 = vector.shape_cast %123 : vector<16xf32> to vector<1x16xf32>
      %125 = vector.broadcast %119 : vector<1x16xf32> to vector<16x16xf32>
      %126 = arith.subf %92, %125 : vector<16x16xf32>
      %127 = math.exp %126 : vector<16x16xf32>
      %cst_74 = arith.constant dense<0.000000e+00> : vector<16xf32>
      %128 = vector.multi_reduction <add>, %127, %cst_74 [0] : vector<16x16xf32> to vector<16xf32>
      %129 = vector.shape_cast %128 : vector<16xf32> to vector<1x16xf32>
      %130 = arith.addf %124, %129 : vector<1x16xf32>
      %131 = math.log %130 : vector<1x16xf32>
      %132 = arith.addf %119, %131 : vector<1x16xf32>
      %cst_75 = arith.constant 0.000000e+00 : f32
      %133 = vector.broadcast %cst_75 : f32 to vector<16x16xf32>
      %134 = arith.select %50, %92, %133 : vector<16x16xi1>, vector<16x16xf32>
      %135 = vector.shape_cast %134 : vector<16x16xf32> to vector<1x16x16xf32>
      %cst_76 = arith.constant dense<0.000000e+00> : vector<1xf32>
      %136 = vector.multi_reduction <add>, %135, %cst_76 [1, 2] : vector<1x16x16xf32> to vector<1xf32>
      %137 = vector.shape_cast %136 : vector<1xf32> to vector<1x1x1xf32>
      %138 = vector.extract %137[0, 0, 0] : f32 from vector<1x1x1xf32>
      %139 = vector.broadcast %138 : f32 to vector<1x1xf32>
      %cst_77 = arith.constant 2.000000e+00 : f32
      %140 = vector.broadcast %cst_77 : f32 to vector<1x1xf32>
      %141 = arith.mulf %140, %139 : vector<1x1xf32>
      %cst_78 = arith.constant dense<0.000000e+00> : vector<1xf32>
      %142 = vector.multi_reduction <add>, %114, %cst_78 [0] : vector<16x1xf32> to vector<1xf32>
      %143 = vector.shape_cast %142 : vector<1xf32> to vector<1x1xf32>
      %cst_79 = arith.constant dense<0.000000e+00> : vector<1xf32>
      %144 = vector.multi_reduction <add>, %132, %cst_79 [1] : vector<1x16xf32> to vector<1xf32>
      %145 = vector.shape_cast %144 : vector<1xf32> to vector<1x1xf32>
      %146 = arith.addf %143, %145 : vector<1x1xf32>
      %147 = arith.subf %146, %141 : vector<1x1xf32>
      %cst_80 = arith.constant 3.200000e+01 : f32
      %148 = vector.broadcast %cst_80 : f32 to vector<1x1xf32>
      %149 = arith.divf %147, %148 : vector<1x1xf32>
      %150 = vector.shape_cast %45 : vector<1x16xf32> to vector<1x1x16xf32>
      %cst_81 = arith.constant dense<0.000000e+00> : vector<1xf32>
      %151 = vector.multi_reduction <add>, %150, %cst_81 [1, 2] : vector<1x1x16xf32> to vector<1xf32>
      %152 = vector.shape_cast %151 : vector<1xf32> to vector<1x1x1xf32>
      %153 = vector.extract %152[0, 0, 0] : f32 from vector<1x1x1xf32>
      %154 = vector.broadcast %153 : f32 to vector<1x1xf32>
      %155 = vector.broadcast %154 : vector<1x1xf32> to vector<1x16xf32>
      %156 = arith.divf %45, %155 : vector<1x16xf32>
      %157 = vector.shape_cast %47 : vector<1x16xf32> to vector<1x1x16xf32>
      %cst_82 = arith.constant dense<0.000000e+00> : vector<1xf32>
      %158 = vector.multi_reduction <add>, %157, %cst_82 [1, 2] : vector<1x1x16xf32> to vector<1xf32>
      %159 = vector.shape_cast %158 : vector<1xf32> to vector<1x1x1xf32>
      %160 = vector.extract %159[0, 0, 0] : f32 from vector<1x1x1xf32>
      %161 = vector.broadcast %160 : f32 to vector<1x1xf32>
      %162 = vector.broadcast %161 : vector<1x1xf32> to vector<1x16xf32>
      %163 = arith.divf %47, %162 : vector<1x16xf32>
      %cst_83 = arith.constant 0.000000e+00 : f32
      %164 = vector.broadcast %cst_83 : f32 to vector<1x16xf32>
      %165 = arith.cmpf ogt, %156, %164 : vector<1x16xf32>
      %cst_84 = arith.constant 1.000000e+00 : f32
      %166 = vector.broadcast %cst_84 : f32 to vector<1x16xf32>
      %167 = arith.select %165, %156, %166 : vector<1x16xi1>, vector<1x16xf32>
      %168 = math.log %167 : vector<1x16xf32>
      %169 = arith.mulf %156, %168 : vector<1x16xf32>
      %170 = vector.shape_cast %169 : vector<1x16xf32> to vector<1x1x16xf32>
      %cst_85 = arith.constant dense<0.000000e+00> : vector<1xf32>
      %171 = vector.multi_reduction <add>, %170, %cst_85 [1, 2] : vector<1x1x16xf32> to vector<1xf32>
      %172 = vector.shape_cast %171 : vector<1xf32> to vector<1x1x1xf32>
      %173 = vector.extract %172[0, 0, 0] : f32 from vector<1x1x1xf32>
      %174 = vector.broadcast %173 : f32 to vector<1x1xf32>
      %cst_86 = arith.constant 2.77258873 : f32
      %175 = vector.broadcast %cst_86 : f32 to vector<1x1xf32>
      %176 = arith.addf %175, %174 : vector<1x1xf32>
      %cst_87 = arith.constant 0.000000e+00 : f32
      %177 = vector.broadcast %cst_87 : f32 to vector<1x16xf32>
      %178 = arith.cmpf ogt, %163, %177 : vector<1x16xf32>
      %cst_88 = arith.constant 1.000000e+00 : f32
      %179 = vector.broadcast %cst_88 : f32 to vector<1x16xf32>
      %180 = arith.select %178, %163, %179 : vector<1x16xi1>, vector<1x16xf32>
      %181 = math.log %180 : vector<1x16xf32>
      %182 = arith.mulf %163, %181 : vector<1x16xf32>
      %183 = vector.shape_cast %182 : vector<1x16xf32> to vector<1x1x16xf32>
      %cst_89 = arith.constant dense<0.000000e+00> : vector<1xf32>
      %184 = vector.multi_reduction <add>, %183, %cst_89 [1, 2] : vector<1x1x16xf32> to vector<1xf32>
      %185 = vector.shape_cast %184 : vector<1xf32> to vector<1x1x1xf32>
      %186 = vector.extract %185[0, 0, 0] : f32 from vector<1x1x1xf32>
      %187 = vector.broadcast %186 : f32 to vector<1x1xf32>
      %cst_90 = arith.constant 2.77258873 : f32
      %188 = vector.broadcast %cst_90 : f32 to vector<1x1xf32>
      %189 = arith.addf %188, %187 : vector<1x1xf32>
      %190 = arith.addf %149, %176 : vector<1x1xf32>
      %191 = arith.addf %190, %189 : vector<1x1xf32>
      %c0_91 = arith.constant 0 : index
      %c0_92 = arith.constant 0 : index
      %192 = vector.load %arg5[%c0_91, %c0_92] : memref<1x1xf32, #tpu.memory_space<vmem>>, vector<1x1xf32>
      tpu.vector_store %arg5[%c0_91, %c0_92], %191 {strides = array<i32>} : memref<1x1xf32, #tpu.memory_space<vmem>>, vector<1x1xf32>,
    } else {
    }
    return
  }
  func.func @transform_0(%arg0: i32) -> (i32, i32) {
    %c0_i32 = arith.constant 0 : i32
    %c0_i32_0 = arith.constant 0 : i32
    return %arg0, %c0_i32 : i32, i32
  }
  func.func @transform_1(%arg0: i32) -> (i32, i32) {
    %c0_i32 = arith.constant 0 : i32
    %c0_i32_0 = arith.constant 0 : i32
    return %arg0, %c0_i32 : i32, i32
  }
  func.func @transform_2(%arg0: i32) -> (i32, i32) {
    %c0_i32 = arith.constant 0 : i32
    %c0_i32_0 = arith.constant 0 : i32
    %c0_i32_1 = arith.constant 0 : i32
    return %c0_i32, %c0_i32_0 : i32, i32
  }
  func.func @transform_3(%arg0: i32) -> (i32, i32) {
    %c0_i32 = arith.constant 0 : i32
    %c0_i32_0 = arith.constant 0 : i32
    %c0_i32_1 = arith.constant 0 : i32
    return %c0_i32, %c0_i32_0 : i32, i32
  }
  func.func @transform_4(%arg0: i32) -> (i32, i32) {
    %c0_i32 = arith.constant 0 : i32
    %c0_i32_0 = arith.constant 0 : i32
    %c0_i32_1 = arith.constant 0 : i32
    return %c0_i32, %c0_i32_0 : i32, i32
  }
}

</mosaic_0001>

<bundles_post_ra>
// kernel: tpu_custom_call.1
= control target key start
LH: loop header
LB: loop body
LE: loop exit
PB: predicated region body
PF: predicated region fallthrough
CT: control target
= control target key end

     0   :  { %s3394_s0 = inlined_call_operand.vmem [shape: f32[8,128], index: 0, kind: input, shape index: {}]   ;;  %s3395_s1 = inlined_call_operand.vmem [shape: f32[8,128], index: 1, kind: input, shape index: {}]   ;;  %s3396_s2 = inlined_call_operand.vmem [shape: f32[128,16], index: 2, kind: input, shape index: {}]   ;;  %s3397_s3 = inlined_call_operand.vmem [shape: f32[128,128], index: 3, kind: input, shape index: {}]   ;;  %s3398_s4 = inlined_call_operand.hbm [shape: f32[1,1], index: 4, kind: output, shape index: {}]  }
   0x1   :  { %v2872_v0 = vld [vmem:[%s3394_s0] sm:$0xff] }
   0x2   :  { %9 = vsyncpa [#allocation8], 0  ;;  %108 = vxpose.xlu0.b32.start.end [1/1] (short) %v2872_v0, 128  ;;  %2148 = vmatprep.subr.mxu0 %v2872_v0  ;;  %v2879_v1 = vld [vmem:[%s3395_s1] sm:$0xff]  ;;  %vm140_vm0 = vcmask 64512   ;;  %v836_v3 = vld [vmem:[%s3396_s2 + $0x8] sm:$0xff]  ;;  %vm2842_vm1 = vmmov 0  }
   0x3   :  { %2149 = vmatpush3.msra.mxu0 %v2872_v0  ;;  %2746 = vmatprep.subr.mxu1 %v2872_v0  ;;  %v835_v2 = vld [vmem:[%s3396_s2] sm:$0xff]  ;;  %v2902_v6 = vld [vmem:[%s3396_s2 + $0x10] sm:$0xff]  ;;  %v838_v8 = vld [vmem:[%s3396_s2 + $0x18] sm:$0xff]  ;;  %vm1598_vm3 = vcmask 130048   ;;  %vm1828_vm5 = vcmask 122880   ;;  %s2843_s27 = smov [#allocation7]  }
   0x4   :  { %2747 = vmatpush3.msra.mxu1 %v2872_v0  ;;  %2200 = vmatprep.subr.mxu0 %v2879_v1  ;;  %v2897_v5 = vpack.c.bf16 %v836_v3, %v835_v2  ;;  %v839_v10 = vld [vmem:[%s3396_s2 + $0x20] sm:$0xff]  ;;  %v840_v12 = vld [vmem:[%s3396_s2 + $0x28] sm:$0xff]  ;;  %v841_v14 = vld [vmem:[%s3396_s2 + $0x30] sm:$0xff]  ;;  %v2968_v36 = vpack.c.bf16 %v838_v8, %v2902_v6  ;;  %s1899_s28 = sshll.u32 %s2843_s27, 4  ;;  %s1900_s28 = int_to_ptr.vmem [resolvable:$true] %s1899_s28 }
   0x5   :  { %2174 = vmatprep.subr.mxu1 %v2879_v1  ;;  %899 = vxpose.xlu1.b32.start [1/16] (narrow) %v835_v2, 16  ;;  %v842_v16 = vld [vmem:[%s3396_s2 + $0x38] sm:$0xff]  ;;  %v843_v18 = vld [vmem:[%s3396_s2 + $0x40] sm:$0xff]  ;;  %v844_v20 = vld [vmem:[%s3396_s2 + $0x48] sm:$0xff]  ;;  %v2974_v38 = vpack.c.bf16 %v840_v12, %v839_v10  ;;  %s2816_s29 = scalar_lea.vmem %s1900_s28, 16  ;;  %s2820_s30 = scalar_lea.vmem %s1900_s28, 32 }
   0x6   :  { %v845_v22 = vld [vmem:[%s3396_s2 + $0x50] sm:$0xff]  ;;  %v846_v24 = vld [vmem:[%s3396_s2 + $0x58] sm:$0xff]  ;;  %v847_v26 = vld [vmem:[%s3396_s2 + $0x60] sm:$0xff]  ;;  %v2981_v40 = vpack.c.bf16 %v842_v16, %v841_v14  ;;  %v2988_v42 = vpack.c.bf16 %v844_v20, %v843_v18  ;;  %p2817_p0 = scmp.ne.s32.totalorder %s1900_s28, %s2816_s29  ;;  %p2821_p1 = scmp.lt.s32.totalorder %s1900_s28, %s1900_s28 }
   0x7   :  { %v848_v28 = vld [vmem:[%s3396_s2 + $0x68] sm:$0xff]  ;;  %v849_v30 = vld [vmem:[%s3396_s2 + $0x70] sm:$0xff]  ;;  %v850_v32 = vld [vmem:[%s3396_s2 + $0x78] sm:$0xff]  ;;  %v2995_v44 = vpack.c.bf16 %v846_v24, %v845_v22  ;;  %p2822_p2 = scmp.lt.s32.totalorder %s2820_s30, %s2816_s29 }
   0x8   :  { %v3002_v46 = vpack.c.bf16 %v848_v28, %v847_v26  ;;  %v3009_v48 = vpack.c.bf16 %v850_v32, %v849_v30  ;;  %v3032_v59 = vld [vmem:[%s3397_s3 + $0x8] sm:$0xff]  ;;  %v3037_v60 = vld [vmem:[%s3397_s3] sm:$0xff] }
   0x9   :  { %900 = vxpose.xlu1.b32.cont [2/16] (narrow) %v836_v3, 16  ;;  %p2823_p3 = por %p2822_p2, %p2821_p1 }
   0xb   :  { %p2824_p4 = pnand %p2823_p3, %p2817_p0 }
   0xd   :  { %901 = vxpose.xlu1.b32.cont [3/16] (narrow) %v2902_v6, 16  ;;  %v3049_v6 = vld [vmem:[%s3397_s3 + $0x10] sm:$0xff] }
  0x11   :  { %902 = vxpose.xlu1.b32.cont [4/16] (narrow) %v838_v8, 16 }
  0x15   :  { %903 = vxpose.xlu1.b32.cont [5/16] (narrow) %v839_v10, 16 }
  0x19   :  { %904 = vxpose.xlu1.b32.cont [6/16] (narrow) %v840_v12, 16  ;;  %v3056_v12 = vld [vmem:[%s3397_s3 + $0x28] sm:$0xff] }
  0x1d   :  { %905 = vxpose.xlu1.b32.cont [7/16] (narrow) %v841_v14, 16 }
  0x21   :  { %906 = vxpose.xlu1.b32.cont [8/16] (narrow) %v842_v16, 16 }
  0x25   :  { %907 = vxpose.xlu1.b32.cont [9/16] (narrow) %v843_v18, 16 }
  0x29   :  { %908 = vxpose.xlu1.b32.cont [10/16] (narrow) %v844_v20, 16  ;;  %v3073_v20 = vld [vmem:[%s3397_s3 + $0x30] sm:$0xff] }
  0x2d   :  { %909 = vxpose.xlu1.b32.cont [11/16] (narrow) %v845_v22, 16 }
  0x31   :  { %910 = vxpose.xlu1.b32.cont [12/16] (narrow) %v846_v24, 16 }
  0x35   :  { %911 = vxpose.xlu1.b32.cont [13/16] (narrow) %v847_v26, 16  ;;  %v3080_v26 = vld [vmem:[%s3397_s3 + $0x48] sm:$0xff] }
  0x39   :  { %912 = vxpose.xlu1.b32.cont [14/16] (narrow) %v848_v28, 16 }
  0x3d   :  { %913 = vxpose.xlu1.b32.cont [15/16] (narrow) %v849_v30, 16 }
  0x3f   :  { %575 = vxpose.xlu0.b32.start.end [1/1] (short) %v2879_v1, 128 }
  0x41   :  { %914 = vxpose.xlu1.b32.end [16/16] (narrow) %v850_v32, 16 }
  0x82   :  { %v2893_v4 = vpop.trf.xlu0 }
  0x83   :  { %2150 = vmatprep.mubr.msk.f32.mxu0 %vm140_vm0, %v2893_v4 }
  0x85   :  { %v3026_v58 = vpop.trf.xlu1 }
  0x86   :  { %v125_v7 = vpop.trf.xlu0 }
  0x87   :  { %2151 = vmatmul.mubr.msk.f32.vlgmr.msra.gmra.mrb[0].mxu0 %vm140_vm0, %v125_v7 }
  0x88   :  { %2201 = vmatpush3.msra.mxu0 %v2879_v1 }
  0x89   :  { %2539 = vmatprep.subr.bf16.mxu0 %v2897_v5 }
  0x8a   :  { %v126_v9 = vpop.trf.xlu0 }
  0x8b   :  { %2153 = vmatprep.mubr.msk.f32.mxu0 %vm140_vm0, %v126_v9 }
  0x8e   :  { %v127_v11 = vpop.trf.xlu0 }
  0x8f   :  { %2154 = vmatmul.mubr.msk.f32.gmra.mrb[2].mxu0 %vm140_vm0, %v127_v11 }
  0x92   :  { %v128_v13 = vpop.trf.xlu0 }
  0x93   :  { %2156 = vmatprep.mubr.msk.f32.mxu0 %vm140_vm0, %v128_v13 }
  0x96   :  { %v129_v15 = vpop.trf.xlu0 }
  0x97   :  { %2157 = vmatmul.mubr.msk.f32.gmra.mrb[4].mxu0 %vm140_vm0, %v129_v15 }
  0x9a   :  { %v130_v17 = vpop.trf.xlu0 }
  0x9b   :  { %2159 = vmatprep.mubr.msk.f32.mxu0 %vm140_vm0, %v130_v17 }
  0x9e   :  { %v131_v19 = vpop.trf.xlu0 }
  0x9f   :  { %2160 = vmatmul.mubr.msk.f32.gmra.mrb[6].mxu0 %vm140_vm0, %v131_v19 }
  0xa2   :  { %v132_v21 = vpop.trf.xlu0 }
  0xa3   :  { %2162 = vmatprep.mubr.msk.f32.mxu1 %vm140_vm0, %v132_v21 }
  0xa6   :  { %v133_v23 = vpop.trf.xlu0 }
  0xa7   :  { %2163 = vmatmul.mubr.msk.f32.vlgmr.msra.gmra.mrb[0].mxu1 %vm140_vm0, %v133_v23 }
  0xa8   :  { %2175 = vmatpush3.msra.mxu1 %v2879_v1 }
  0xaa   :  { %v134_v25 = vpop.trf.xlu0 }
  0xab   :  { %2165 = vmatprep.mubr.msk.f32.mxu1 %vm140_vm0, %v134_v25 }
  0xae   :  { %v135_v27 = vpop.trf.xlu0 }
  0xaf   :  { %2166 = vmatmul.mubr.msk.f32.gmra.mrb[2].mxu1 %vm140_vm0, %v135_v27 }
  0xb2   :  { %v136_v29 = vpop.trf.xlu0 }
  0xb3   :  { %2168 = vmatprep.mubr.msk.f32.mxu1 %vm140_vm0, %v136_v29 }
  0xb6   :  { %v137_v31 = vpop.trf.xlu0 }
  0xb7   :  { %2169 = vmatmul.mubr.msk.f32.gmra.mrb[4].mxu1 %vm140_vm0, %v137_v31 }
  0xba   :  { %v138_v33 = vpop.trf.xlu0 }
  0xbb   :  { %2171 = vmatprep.mubr.msk.f32.mxu1 %vm140_vm0, %v138_v33 }
  0xbe   :  { %v139_v34 = vpop.trf.xlu0 }
  0xbf   :  { %2172 = vmatmul.mubr.msk.f32.gmra.mrb[6].mxu1 %vm140_vm0, %v139_v34 }
  0xc0   :  { %2176 = vmatprep.mubr.msk.f32.mxu1 %vm140_vm0, %v2893_v4  ;;  %v3044_v4 = vld [vmem:[%s3397_s3 + $0x18] sm:$0xff] }
  0xc2   :  { %v591_v35 = vpop.trf.xlu0 }
  0xc3   :  { %2177 = vmatmul.mubr.msk.f32.vlgmr.msra.gmra.mrb[8].mxu1 %vm140_vm0, %v125_v7  ;;  %2202 = vmatprep.mubr.msk.f32.mxu0 %vm140_vm0, %v591_v35 }
  0xc4   :  { %2179 = vmatprep.mubr.msk.f32.mxu1 %vm140_vm0, %v126_v9 }
  0xc6   :  { %v592_v37 = vpop.trf.xlu0 }
  0xc7   :  { %2180 = vmatmul.mubr.msk.f32.gmra.mrb[10].mxu1 %vm140_vm0, %v127_v11  ;;  %2203 = vmatmul.mubr.msk.f32.vlgmr.msra.gmra.mrb[8].mxu0 %vm140_vm0, %v592_v37 }
  0xc8   :  { %2182 = vmatprep.mubr.msk.f32.mxu1 %vm140_vm0, %v128_v13  ;;  %2541 = vmatpush3.bf16.msra.mxu0 %v2897_v5  ;;  %v3061_v13 = vld [vmem:[%s3397_s3 + $0x20] sm:$0xff] }
  0xc9   :  { %2543 = vmatprep.subr.bf16.mxu0 %v2968_v36 }
  0xca   :  { %v593_v39 = vpop.trf.xlu0 }
  0xcb   :  { %2183 = vmatmul.mubr.msk.f32.gmra.mrb[12].mxu1 %vm140_vm0, %v129_v15  ;;  %2205 = vmatprep.mubr.msk.f32.mxu0 %vm140_vm0, %v593_v39 }
  0xcc   :  { %2185 = vmatprep.mubr.msk.f32.mxu1 %vm140_vm0, %v130_v17  ;;  %2545 = vmatpush3.bf16.msra.mxu0 %v2968_v36 }
  0xcd   :  { %2547 = vmatprep.subr.bf16.mxu0 %v2974_v38 }
  0xce   :  { %v594_v41 = vpop.trf.xlu0 }
  0xcf   :  { %2186 = vmatmul.mubr.msk.f32.gmra.mrb[14].mxu1 %vm140_vm0, %v131_v19  ;;  %2206 = vmatmul.mubr.msk.f32.gmra.mrb[10].mxu0 %vm140_vm0, %v594_v41  ;;  %v3068_v19 = vld [vmem:[%s3397_s3 + $0x38] sm:$0xff] }
  0xd0   :  { %2188 = vmatprep.mubr.msk.f32.mxu1 %vm140_vm0, %v132_v21  ;;  %2549 = vmatpush3.bf16.msra.mxu0 %v2974_v38 }
  0xd1   :  { %2551 = vmatprep.subr.bf16.mxu0 %v2981_v40 }
  0xd2   :  { %v595_v43 = vpop.trf.xlu0 }
  0xd3   :  { %2189 = vmatmul.mubr.msk.f32.gmra.mrb[16].mxu1 %vm140_vm0, %v133_v23  ;;  %2208 = vmatprep.mubr.msk.f32.mxu0 %vm140_vm0, %v595_v43 }
  0xd4   :  { %2191 = vmatprep.mubr.msk.f32.mxu1 %vm140_vm0, %v134_v25  ;;  %2553 = vmatpush3.bf16.msra.mxu0 %v2981_v40 }
  0xd5   :  { %2555 = vmatprep.subr.bf16.mxu0 %v2988_v42 }
  0xd6   :  { %v596_v45 = vpop.trf.xlu0 }
  0xd7   :  { %2192 = vmatmul.mubr.msk.f32.gmra.mrb[18].mxu1 %vm140_vm0, %v135_v27  ;;  %2209 = vmatmul.mubr.msk.f32.gmra.mrb[12].mxu0 %vm140_vm0, %v596_v45  ;;  %v3085_v27 = vld [vmem:[%s3397_s3 + $0x40] sm:$0xff]  ;;  %v3104_v45 = vld [vmem:[%s3397_s3 + $0x68] sm:$0xff] }
  0xd8   :  { %2194 = vmatprep.mubr.msk.f32.mxu1 %vm140_vm0, %v136_v29  ;;  %2557 = vmatpush3.bf16.msra.mxu0 %v2988_v42 }
  0xd9   :  { %2559 = vmatprep.subr.bf16.mxu0 %v2995_v44 }
  0xda   :  { %v597_v47 = vpop.trf.xlu0 }
  0xdb   :  { %2195 = vmatmul.mubr.msk.f32.gmra.mrb[20].mxu1 %vm140_vm0, %v137_v31  ;;  %2211 = vmatprep.mubr.msk.f32.mxu0 %vm140_vm0, %v597_v47  ;;  %v3109_v47 = vld [vmem:[%s3397_s3 + $0x60] sm:$0xff] }
  0xdc   :  { %2197 = vmatprep.mubr.msk.f32.mxu1 %vm140_vm0, %v138_v33  ;;  %2561 = vmatpush3.bf16.msra.mxu0 %v2995_v44  ;;  %v3092_v33 = vld [vmem:[%s3397_s3 + $0x58] sm:$0xff] }
  0xdd   :  { %2563 = vmatprep.subr.bf16.mxu0 %v3002_v46 }
  0xde   :  { %v598_v49 = vpop.trf.xlu0 }
  0xdf   :  { %2198 = vmatmul.mubr.msk.f32.gmra.mrb[22].mxu1 %vm140_vm0, %v139_v34  ;;  %2212 = vmatmul.mubr.msk.f32.gmra.mrb[14].mxu0 %vm140_vm0, %v598_v49  ;;  %v3097_v34 = vld [vmem:[%s3397_s3 + $0x50] sm:$0xff] }
  0xe0   :  { %2565 = vmatpush3.bf16.msra.mxu0 %v3002_v46  ;;  %2258 = vmatprep.mubr.f32.mxu1 %v3026_v58 }
  0xe1   :  { %2567 = vmatprep.subr.bf16.mxu0 %v3009_v48 }
  0xe2   :  { %v599_v50 = vpop.trf.xlu0 }
  0xe3   :  { %2214 = vmatprep.mubr.msk.f32.mxu0 %vm140_vm0, %v599_v50 }
  0xe4   :  { %2569 = vmatpush3.bf16.msra.mxu0 %v3009_v48 }
  0xe5   :  { %2603 = vmatprep.subr.bf16.mxu0 %v2897_v5 }
  0xe6   :  { %v600_v51 = vpop.trf.xlu0 }
  0xe7   :  { %2215 = vmatmul.mubr.msk.f32.gmra.mrb[16].mxu0 %vm140_vm0, %v600_v51 }
  0xea   :  { %v601_v52 = vpop.trf.xlu0 }
  0xeb   :  { %2217 = vmatprep.mubr.msk.f32.mxu0 %vm140_vm0, %v601_v52 }
  0xee   :  { %v602_v53 = vpop.trf.xlu0 }
  0xef   :  { %2218 = vmatmul.mubr.msk.f32.gmra.mrb[18].mxu0 %vm140_vm0, %v602_v53 }
  0xf2   :  { %v603_v54 = vpop.trf.xlu0 }
  0xf3   :  { %2220 = vmatprep.mubr.msk.f32.mxu0 %vm140_vm0, %v603_v54  ;;  %v3116_v54 = vld [vmem:[%s3397_s3 + $0x78] sm:$0xff] }
  0xf6   :  { %v604_v55 = vpop.trf.xlu0 }
  0xf7   :  { %2221 = vmatmul.mubr.msk.f32.gmra.mrb[20].mxu0 %vm140_vm0, %v604_v55  ;;  %v3121_v55 = vld [vmem:[%s3397_s3 + $0x70] sm:$0xff] }
  0xfa   :  { %v605_v56 = vpop.trf.xlu0 }
  0xfb   :  { %2223 = vmatprep.mubr.msk.f32.mxu0 %vm140_vm0, %v605_v56 }
  0xfe   :  { %v606_v57 = vpop.trf.xlu0 }
  0xff   :  { %2224 = vmatmul.mubr.msk.f32.gmra.mrb[22].mxu0 %vm140_vm0, %v606_v57 }
 0x15a   :  { %v2152_v61 = vpop.f32.mrb[0].mxu0 }
 0x15b   :  { %v884_v62 = vmul.f32 %v2152_v61, %v3032_v59  ;;  %v255_v63 = vpop.f32.mrb[1].mxu0 }
 0x15c   :  { %v883_v2 = vmul.f32 %v3037_v60, %v255_v63 }
 0x15e   :  { %v2506_v3 = vpack.c.bf16 %v884_v62, %v883_v2 }
 0x160   :  { %2507 = vmatprep.subr.bf16.mxu1 %v2506_v3 }
 0x161   :  { %2509 = vmatpush3.bf16.msra.mxu1 %v2506_v3 }
 0x162   :  { %v2155_v7 = vpop.f32.mrb[2].mxu0 }
 0x163   :  { %v886_v8 = vmul.f32 %v2155_v7, %v3044_v4  ;;  %v265_v9 = vpop.f32.mrb[3].mxu0 }
 0x164   :  { %v885_v10 = vmul.f32 %v3049_v6, %v265_v9  ;;  %v3127_v9 = vpop.trf.xlu1 }
 0x166   :  { %v2510_v11 = vpack.c.bf16 %v886_v8, %v885_v10 }
 0x168   :  { %2511 = vmatprep.subr.bf16.mxu1 %v2510_v11 }
 0x169   :  { %2513 = vmatpush3.bf16.msra.mxu1 %v2510_v11 }
 0x16a   :  { %v2158_v14 = vpop.f32.mrb[4].mxu0 }
 0x16b   :  { %v888_v15 = vmul.f32 %v2158_v14, %v3056_v12  ;;  %v275_v16 = vpop.f32.mrb[5].mxu0 }
 0x16c   :  { %v887_v17 = vmul.f32 %v3061_v13, %v275_v16 }
 0x16e   :  { %v2514_v18 = vpack.c.bf16 %v888_v15, %v887_v17 }
 0x170   :  { %2515 = vmatprep.subr.bf16.mxu1 %v2514_v18 }
 0x171   :  { %2517 = vmatpush3.bf16.msra.mxu1 %v2514_v18 }
 0x172   :  { %v2161_v21 = vpop.f32.mrb[6].mxu0 }
 0x173   :  { %v890_v22 = vmul.f32 %v2161_v21, %v3068_v19  ;;  %v285_v23 = vpop.f32.mrb[7].mxu0 }
 0x174   :  { %v889_v24 = vmul.f32 %v3073_v20, %v285_v23 }
 0x176   :  { %v2518_v25 = vpack.c.bf16 %v890_v22, %v889_v24 }
 0x178   :  { %2519 = vmatprep.subr.bf16.mxu1 %v2518_v25 }
 0x179   :  { %2521 = vmatpush3.bf16.msra.mxu1 %v2518_v25 }
 0x17a   :  { %v2164_v28 = vpop.f32.mrb[0].mxu1 }
 0x17b   :  { %v892_v29 = vmul.f32 %v2164_v28, %v3080_v26  ;;  %v295_v30 = vpop.f32.mrb[1].mxu1 }
 0x17c   :  { %v891_v31 = vmul.f32 %v3085_v27, %v295_v30 }
 0x17e   :  { %v2522_v32 = vpack.c.bf16 %v892_v29, %v891_v31 }
 0x180   :  { %2523 = vmatprep.subr.bf16.mxu1 %v2522_v32 }
 0x181   :  { %2525 = vmatpush3.bf16.msra.mxu1 %v2522_v32 }
 0x182   :  { %v2167_v35 = vpop.f32.mrb[2].mxu1 }
 0x183   :  { %v894_v37 = vmul.f32 %v2167_v35, %v3092_v33  ;;  %v305_v39 = vpop.f32.mrb[3].mxu1 }
 0x184   :  { %v893_v41 = vmul.f32 %v3097_v34, %v305_v39 }
 0x186   :  { %v2526_v43 = vpack.c.bf16 %v894_v37, %v893_v41 }
 0x188   :  { %2527 = vmatprep.subr.bf16.mxu1 %v2526_v43 }
 0x189   :  { %2529 = vmatpush3.bf16.msra.mxu1 %v2526_v43 }
 0x18a   :  { %v2170_v49 = vpop.f32.mrb[4].mxu1 }
 0x18b   :  { %v896_v50 = vmul.f32 %v2170_v49, %v3104_v45  ;;  %v315_v51 = vpop.f32.mrb[5].mxu1 }
 0x18c   :  { %v895_v52 = vmul.f32 %v3109_v47, %v315_v51 }
 0x18e   :  { %v2530_v53 = vpack.c.bf16 %v896_v50, %v895_v52 }
 0x190   :  { %2531 = vmatprep.subr.bf16.mxu1 %v2530_v53 }
 0x191   :  { %2533 = vmatpush3.bf16.msra.mxu1 %v2530_v53 }
 0x192   :  { %v2173_v56 = vpop.f32.mrb[6].mxu1 }
 0x193   :  { %v898_v57 = vmul.f32 %v2173_v56, %v3116_v54  ;;  %v325_v61 = vpop.f32.mrb[7].mxu1 }
 0x194   :  { %v897_v62 = vmul.f32 %v3121_v55, %v325_v61 }
 0x196   :  { %v2534_v63 = vpack.c.bf16 %v898_v57, %v897_v62  ;;  %v2178_v2 = vpop.f32.mrb[8].mxu1 }
 0x197   :  { %v1098_v3 = vmul.f32 %v2178_v2, %v3032_v59  ;;  %v448_v7 = vpop.f32.mrb[9].mxu1 }
 0x198   :  { %v1097_v8 = vmul.f32 %v3037_v60, %v448_v7  ;;  %2535 = vmatprep.subr.bf16.mxu1 %v2534_v63 }
 0x199   :  { %2537 = vmatpush3.bf16.msra.mxu1 %v2534_v63 }
 0x19a   :  { %v2570_v10 = vpack.c.bf16 %v1098_v3, %v1097_v8  ;;  %v2181_v11 = vpop.f32.mrb[10].mxu1  ;;  %v2204_v14 = vpop.f32.mrb[8].mxu0 }
 0x19b   :  { %v1100_v15 = vmul.f32 %v2181_v11, %v3044_v4  ;;  %v458_v16 = vpop.f32.mrb[11].mxu1  ;;  %v1280_v17 = vmul.f32 %v2204_v14, %v3032_v59  ;;  %v721_v18 = vpop.f32.mrb[9].mxu0 }
 0x19c   :  { %v1099_v21 = vmul.f32 %v3049_v6, %v458_v16  ;;  %2259 = vmatmul.mubr.f32.vlgmr.msra.gmra.mrb[24].mxu1 %v3127_v9  ;;  %2571 = vmatprep.subr.bf16.mxu1 %v2570_v10  ;;  %v1279_v22 = vmul.f32 %v3037_v60, %v721_v18 }
 0x19d   :  { %2573 = vmatpush3.bf16.msra.mxu1 %v2570_v10  ;;  %2328 = vmatprep.mubr.f32.mxu1 %v3026_v58 }
 0x19e   :  { %v2574_v23 = vpack.c.bf16 %v1100_v15, %v1099_v21  ;;  %v2184_v24 = vpop.f32.mrb[12].mxu1  ;;  %v3135_v25 = vpack.c.bf16 %v1280_v17, %v1279_v22 }
 0x19f   :  { %v1102_v28 = vmul.f32 %v2184_v24, %v3056_v12  ;;  %v468_v29 = vpop.f32.mrb[13].mxu1 }
 0x1a0   :  { %v1101_v59 = vmul.f32 %v3061_v13, %v468_v29  ;;  %2575 = vmatprep.subr.bf16.mxu1 %v2574_v23 }
 0x1a1   :  { %2577 = vmatpush3.bf16.msra.mxu1 %v2574_v23 }
 0x1a2   :  { %v2578_v30 = vpack.c.bf16 %v1102_v28, %v1101_v59  ;;  %v2187_v31 = vpop.f32.mrb[14].mxu1  ;;  %v2207_v32 = vpop.f32.mrb[10].mxu0 }
 0x1a3   :  { %v1104_v35 = vmul.f32 %v2187_v31, %v3068_v19  ;;  %v478_v60 = vpop.f32.mrb[15].mxu1  ;;  %v1282_v37 = vmul.f32 %v2207_v32, %v3044_v4  ;;  %v731_v39 = vpop.f32.mrb[11].mxu0 }
 0x1a4   :  { %v1103_v41 = vmul.f32 %v3073_v20, %v478_v60  ;;  %2579 = vmatprep.subr.bf16.mxu1 %v2578_v30  ;;  %v1281_v43 = vmul.f32 %v3049_v6, %v731_v39 }
 0x1a5   :  { %2581 = vmatpush3.bf16.msra.mxu1 %v2578_v30 }
 0x1a6   :  { %v2582_v49 = vpack.c.bf16 %v1104_v35, %v1103_v41  ;;  %v2190_v50 = vpop.f32.mrb[16].mxu1  ;;  %v2638_v51 = vpack.c.bf16 %v1282_v37, %v1281_v43 }
 0x1a7   :  { %v1106_v52 = vmul.f32 %v2190_v50, %v3080_v26  ;;  %v488_v53 = vpop.f32.mrb[17].mxu1 }
 0x1a8   :  { %v1105_v56 = vmul.f32 %v3085_v27, %v488_v53  ;;  %2583 = vmatprep.subr.bf16.mxu1 %v2582_v49 }
 0x1a9   :  { %2585 = vmatpush3.bf16.msra.mxu1 %v2582_v49 }
 0x1aa   :  { %v2586_v57 = vpack.c.bf16 %v1106_v52, %v1105_v56  ;;  %v2193_v61 = vpop.f32.mrb[18].mxu1  ;;  %v2210_v4 = vpop.f32.mrb[12].mxu0 }
 0x1ab   :  { %v1108_v62 = vmul.f32 %v2193_v61, %v3092_v33  ;;  %v498_v63 = vpop.f32.mrb[19].mxu1  ;;  %v1284_v2 = vmul.f32 %v2210_v4, %v3056_v12  ;;  %v741_v6 = vpop.f32.mrb[13].mxu0 }
 0x1ac   :  { %v1107_v3 = vmul.f32 %v3097_v34, %v498_v63  ;;  %2587 = vmatprep.subr.bf16.mxu1 %v2586_v57  ;;  %v1283_v7 = vmul.f32 %v3061_v13, %v741_v6 }
 0x1ad   :  { %2589 = vmatpush3.bf16.msra.mxu1 %v2586_v57 }
 0x1ae   :  { %v2590_v8 = vpack.c.bf16 %v1108_v62, %v1107_v3  ;;  %v2196_v10 = vpop.f32.mrb[20].mxu1  ;;  %v2642_v11 = vpack.c.bf16 %v1284_v2, %v1283_v7 }
 0x1af   :  { %v1110_v14 = vmul.f32 %v2196_v10, %v3104_v45  ;;  %v508_v15 = vpop.f32.mrb[21].mxu1 }
 0x1b0   :  { %v1109_v16 = vmul.f32 %v3109_v47, %v508_v15  ;;  %2591 = vmatprep.subr.bf16.mxu1 %v2590_v8 }
 0x1b1   :  { %2593 = vmatpush3.bf16.msra.mxu1 %v2590_v8 }
 0x1b2   :  { %v2594_v17 = vpack.c.bf16 %v1110_v14, %v1109_v16  ;;  %v2199_v18 = vpop.f32.mrb[22].mxu1  ;;  %v2213_v12 = vpop.f32.mrb[14].mxu0 }
 0x1b3   :  { %v1112_v21 = vmul.f32 %v2199_v18, %v3116_v54  ;;  %v518_v22 = vpop.f32.mrb[23].mxu1  ;;  %v1286_v23 = vmul.f32 %v2213_v12, %v3068_v19  ;;  %v751_v13 = vpop.f32.mrb[15].mxu0 }
 0x1b4   :  { %v1111_v24 = vmul.f32 %v3121_v55, %v518_v22  ;;  %2595 = vmatprep.subr.bf16.mxu1 %v2594_v17  ;;  %v1285_v28 = vmul.f32 %v3073_v20, %v751_v13 }
 0x1b5   :  { %2597 = vmatpush3.bf16.msra.mxu1 %v2594_v17 }
 0x1b6   :  { %v2598_v29 = vpack.c.bf16 %v1112_v21, %v1111_v24  ;;  %v2646_v59 = vpack.c.bf16 %v1286_v23, %v1285_v28 }
 0x1b8   :  { %2599 = vmatprep.subr.bf16.mxu1 %v2598_v29 }
 0x1b9   :  { %2601 = vmatpush3.bf16.msra.mxu1 %v2598_v29 }
 0x1ba   :  { %2635 = vmatprep.subr.bf16.mxu1 %v3135_v25  ;;  %v2216_v30 = vpop.f32.mrb[16].mxu0 }
 0x1bb   :  { %v1288_v31 = vmul.f32 %v2216_v30, %v3080_v26  ;;  %v761_v32 = vpop.f32.mrb[17].mxu0 }
 0x1bc   :  { %2329 = vmatmul.mubr.f32.vlgmr.msra.gmra.mrb[26].mxu1 %v3127_v9  ;;  %v1287_v19 = vmul.f32 %v3085_v27, %v761_v32 }
 0x1bd   :  { %2637 = vmatpush3.bf16.msra.mxu1 %v3135_v25  ;;  %2398 = vmatprep.mubr.f32.mxu1 %v3026_v58 }
 0x1be   :  { %2639 = vmatprep.subr.bf16.mxu1 %v2638_v51  ;;  %v2650_v20 = vpack.c.bf16 %v1288_v31, %v1287_v19 }
 0x1c1   :  { %2641 = vmatpush3.bf16.msra.mxu1 %v2638_v51 }
 0x1c2   :  { %2643 = vmatprep.subr.bf16.mxu1 %v2642_v11  ;;  %v2219_v35 = vpop.f32.mrb[18].mxu0 }
 0x1c3   :  { %v1290_v60 = vmul.f32 %v2219_v35, %v3092_v33  ;;  %v771_v37 = vpop.f32.mrb[19].mxu0 }
 0x1c4   :  { %v1289_v39 = vmul.f32 %v3097_v34, %v771_v37 }
 0x1c5   :  { %2645 = vmatpush3.bf16.msra.mxu1 %v2642_v11 }
 0x1c6   :  { %2647 = vmatprep.subr.bf16.mxu1 %v2646_v59  ;;  %v2654_v26 = vpack.c.bf16 %v1290_v60, %v1289_v39 }
 0x1c9   :  { %2649 = vmatpush3.bf16.msra.mxu1 %v2646_v59 }
 0x1ca   :  { %2651 = vmatprep.subr.bf16.mxu1 %v2650_v20  ;;  %v2222_v27 = vpop.f32.mrb[20].mxu0 }
 0x1cb   :  { %v1292_v25 = vmul.f32 %v2222_v27, %v3104_v45  ;;  %v781_v41 = vpop.f32.mrb[21].mxu0  ;;  %v2840_v45 = vmov 0.0|0.0  }
 0x1cc   :  { %v1291_v58 = vmul.f32 %v3109_v47, %v781_v41  ;;  %v75_v47 = vrot.slane %v2872_v0, 4 }
 0x1cd   :  { %2653 = vmatpush3.bf16.msra.mxu1 %v2650_v20 }
 0x1ce   :  { %v2658_v43 = vpack.c.bf16 %v1292_v25, %v1291_v58  ;;  %2655 = vmatprep.subr.bf16.mxu1 %v2654_v26 }
 0x1d1   :  { %2657 = vmatpush3.bf16.msra.mxu1 %v2654_v26 }
 0x1d2   :  { %v2225_v49 = vpop.f32.mrb[22].mxu0  ;;  %2659 = vmatprep.subr.bf16.mxu1 %v2658_v43 }
 0x1d3   :  { %v1294_v33 = vmul.f32 %v2225_v49, %v3116_v54  ;;  %v791_v34 = vpop.f32.mrb[23].mxu0  ;;  %v84_v54 = vrot.slane %v2879_v1, 4 }
 0x1d4   :  { %v1293_v50 = vmul.f32 %v3121_v55, %v791_v34  ;;  %v2841_v55 = vmov 0.0  }
 0x1d5   :  { %2661 = vmatpush3.bf16.msra.mxu1 %v2658_v43  ;;  %70 = vst [vmem:[#allocation5] sm:$0x1] %v2841_v55  ;;  %71 = vst [vmem:[#allocation6] sm:$0x1] %v2841_v55  ;;  %v85_v52 = vadd.f32 %v84_v54, %v2879_v1 }
 0x1d6   :  { %v2662_v51 = vpack.c.bf16 %v1294_v33, %v1293_v50 }
 0x1d7   :  { %v86_v56 = vrot.slane %v85_v52, 2 }
 0x1d8   :  { %2663 = vmatprep.subr.bf16.mxu1 %v2662_v51 }
 0x1d9   :  { %2665 = vmatpush3.bf16.msra.mxu1 %v2662_v51  ;;  %v87_v61 = vadd.f32 %v86_v56, %v85_v52 }
 0x1da   :  { %2698 = vmatprep.subr.bf16.mxu1 %v2840_v45 }
 0x1db   :  { %v88_v62 = vrot.slane %v87_v61, 1 }
 0x1dc   :  { %2399 = vmatmul.mubr.f32.vlgmr.msra.gmra.mrb[28].mxu1 %v3127_v9  ;;  %v76_v9 = vadd.f32 %v75_v47, %v2872_v0  ;;  %v74_v63 = vld [vmem:[#allocation5] sm:$0x1]  ;;  %v83_v2 = vld [vmem:[#allocation6] sm:$0x1] }
 0x1dd   :  { %2700 = vmatpush3.bf16.msra.mxu1 %v2897_v5  ;;  %2468 = vmatprep.mubr.msk.f32.mxu1 %vm2842_vm1, %v2841_v55  ;;  %v89_v0 = vadd.f32 %v88_v62, %v87_v61 }
 0x1de   :  { %2701 = vmatprep.subr.bf16.mxu1 %v2840_v45  ;;  %v77_v53 = vrot.slane %v76_v9, 2 }
 0x1df   :  { %v90_v1 = vadd.f32 %v89_v0, %v83_v2 }
 0x1e0   :  { %v78_v57 = vadd.f32 %v77_v53, %v76_v9 }
 0x1e1   :  { %2703 = vmatpush3.bf16.msra.mxu1 %v2968_v36  ;;  %91 = vst [vmem:[#allocation6] sm:$0x1] %v90_v1 }
 0x1e2   :  { %2704 = vmatprep.subr.bf16.mxu1 %v2840_v45  ;;  %v79_v4 = vrot.slane %v78_v57, 1 }
 0x1e4   :  { %v80_v6 = vadd.f32 %v79_v4, %v78_v57 }
 0x1e5   :  { %2706 = vmatpush3.bf16.msra.mxu1 %v2974_v38 }
 0x1e6   :  { %2707 = vmatprep.subr.bf16.mxu1 %v2840_v45  ;;  %v81_v3 = vadd.f32 %v80_v6, %v74_v63 }
 0x1e8   :  { %82 = vst [vmem:[#allocation5] sm:$0x1] %v81_v3 }
 0x1e9   :  { %2709 = vmatpush3.bf16.msra.mxu1 %v2981_v40 }
 0x1ea   :  { %2710 = vmatprep.subr.bf16.mxu1 %v2840_v45 }
 0x1ed   :  { %2712 = vmatpush3.bf16.msra.mxu1 %v2988_v42 }
 0x1ee   :  { %2713 = vmatprep.subr.bf16.mxu1 %v2840_v45 }
 0x1ef   :  { %v1445_v7 = vld [vmem:[#allocation5] sm:$0x1] }
 0x1f1   :  { %2715 = vmatpush3.bf16.msra.mxu1 %v2995_v44 }
 0x1f2   :  { %2716 = vmatprep.subr.bf16.mxu1 %v2840_v45 }
 0x1f5   :  { %2718 = vmatpush3.bf16.msra.mxu1 %v3002_v46 }
 0x1f6   :  { %2719 = vmatprep.subr.bf16.mxu1 %v2840_v45 }
 0x1f9   :  { %2721 = vmatpush3.bf16.msra.mxu1 %v3009_v48 }
 0x1fc   :  { %2469 = vmatmul.mubr.f32.vlgmr.msra.gmra.mrb[30].mxu1 %v1445_v7 }
 0x26f   :  { %v2260_v8 = vpop.f32.mrb[24].mxu1 }
 0x270   :  { %v997_v10 = vpop.f32.mrb[25].mxu1 }
 0x271   :  { %2293 = vmatprep.mubr.f32.mxu0 %v997_v10 }
 0x272   :  { %2294 = vmatmul.mubr.f32.vlgmr.msra.gmra.mrb[24].mxu0 %v2260_v8 }
 0x273   :  { %2605 = vmatpush3.bf16.msra.mxu0 %v2897_v5 }
 0x274   :  { %2607 = vmatprep.subr.bf16.mxu0 %v2968_v36 }
 0x277   :  { %2609 = vmatpush3.bf16.msra.mxu0 %v2968_v36 }
 0x278   :  { %2611 = vmatprep.subr.bf16.mxu0 %v2974_v38 }
 0x27b   :  { %2613 = vmatpush3.bf16.msra.mxu0 %v2974_v38 }
 0x27c   :  { %2615 = vmatprep.subr.bf16.mxu0 %v2981_v40 }
 0x27f   :  { %2617 = vmatpush3.bf16.msra.mxu0 %v2981_v40 }
 0x280   :  { %2619 = vmatprep.subr.bf16.mxu0 %v2988_v42 }
 0x283   :  { %2621 = vmatpush3.bf16.msra.mxu0 %v2988_v42 }
 0x284   :  { %2623 = vmatprep.subr.bf16.mxu0 %v2995_v44 }
 0x287   :  { %2625 = vmatpush3.bf16.msra.mxu0 %v2995_v44 }
 0x288   :  { %2627 = vmatprep.subr.bf16.mxu0 %v3002_v46 }
 0x28b   :  { %2629 = vmatpush3.bf16.msra.mxu0 %v3002_v46 }
 0x28c   :  { %2631 = vmatprep.subr.bf16.mxu0 %v3009_v48 }
 0x28f   :  { %v2330_v11 = vpop.f32.mrb[26].mxu1  ;;  %2633 = vmatpush3.bf16.msra.mxu0 %v3009_v48 }
 0x290   :  { %v1179_v14 = vpop.f32.mrb[27].mxu1  ;;  %2667 = vmatprep.subr.bf16.mxu0 %v2897_v5 }
 0x291   :  { %2363 = vmatprep.mubr.f32.mxu0 %v1179_v14 }
 0x292   :  { %2364 = vmatmul.mubr.f32.vlgmr.msra.gmra.mrb[26].mxu0 %v2330_v11 }
 0x293   :  { %2669 = vmatpush3.bf16.msra.mxu0 %v2897_v5 }
 0x294   :  { %2671 = vmatprep.subr.bf16.mxu0 %v2968_v36 }
 0x297   :  { %2673 = vmatpush3.bf16.msra.mxu0 %v2968_v36 }
 0x298   :  { %2675 = vmatprep.subr.bf16.mxu0 %v2974_v38 }
 0x29b   :  { %2677 = vmatpush3.bf16.msra.mxu0 %v2974_v38 }
 0x29c   :  { %2679 = vmatprep.subr.bf16.mxu0 %v2981_v40 }
 0x29f   :  { %2681 = vmatpush3.bf16.msra.mxu0 %v2981_v40 }
 0x2a0   :  { %2683 = vmatprep.subr.bf16.mxu0 %v2988_v42 }
 0x2a3   :  { %2685 = vmatpush3.bf16.msra.mxu0 %v2988_v42 }
 0x2a4   :  { %2687 = vmatprep.subr.bf16.mxu0 %v2995_v44 }
 0x2a7   :  { %2689 = vmatpush3.bf16.msra.mxu0 %v2995_v44 }
 0x2a8   :  { %2691 = vmatprep.subr.bf16.mxu0 %v3002_v46 }
 0x2ab   :  { %2693 = vmatpush3.bf16.msra.mxu0 %v3002_v46 }
 0x2ac   :  { %2695 = vmatprep.subr.bf16.mxu0 %v3009_v48 }
 0x2af   :  { %v2400_v15 = vpop.f32.mrb[28].mxu1  ;;  %2697 = vmatpush3.bf16.msra.mxu0 %v3009_v48 }
 0x2b0   :  { %v1361_v16 = vpop.f32.mrb[29].mxu1  ;;  %2722 = vmatprep.subr.bf16.mxu0 %v2840_v45 }
 0x2b1   :  { %2433 = vmatprep.mubr.f32.mxu0 %v1361_v16 }
 0x2b2   :  { %2434 = vmatmul.mubr.f32.vlgmr.msra.gmra.mrb[28].mxu0 %v2400_v15 }
 0x2b3   :  { %2724 = vmatpush3.bf16.msra.mxu0 %v2897_v5  ;;  %2503 = vmatprep.mubr.msk.f32.mxu0 %vm2842_vm1, %v2841_v55  ;;  %v1516_v5 = vld [vmem:[#allocation6] sm:$0x1] }
 0x2b4   :  { %2725 = vmatprep.subr.bf16.mxu0 %v2840_v45 }
 0x2b7   :  { %2727 = vmatpush3.bf16.msra.mxu0 %v2968_v36  ;;  %v1587_v36 = vlaneseq }
 0x2b8   :  { %2728 = vmatprep.subr.bf16.mxu0 %v2840_v45 }
 0x2b9   :  { %v1591_v17 = vand.u32 127, %v1587_v36 }
 0x2bb   :  { %2730 = vmatpush3.bf16.msra.mxu0 %v2974_v38  ;;  %v1588_v38 = vshrl.u32 %v1587_v36, 7 }
 0x2bc   :  { %2731 = vmatprep.subr.bf16.mxu0 %v2840_v45 }
 0x2bd   :  { %vm3245_vm4 = vcmp.eq.s32.totalorder %v1588_v38, %v1591_v17 }
 0x2bf   :  { %2733 = vmatpush3.bf16.msra.mxu0 %v2981_v40  ;;  %v1589_v40 = vadd.s32 8, %v1588_v38 }
 0x2c0   :  { %2734 = vmatprep.subr.bf16.mxu0 %v2840_v45 }
 0x2c1   :  { %vm3241_vm2 = vcmp.eq.s32.totalorder %v1589_v40, %v1591_v17 }
 0x2c3   :  { %2736 = vmatpush3.bf16.msra.mxu0 %v2988_v42 }
 0x2c4   :  { %2737 = vmatprep.subr.bf16.mxu0 %v2840_v45 }
 0x2c7   :  { %2739 = vmatpush3.bf16.msra.mxu0 %v2995_v44 }
 0x2c8   :  { %2740 = vmatprep.subr.bf16.mxu0 %v2840_v45 }
 0x2cb   :  { %2742 = vmatpush3.bf16.msra.mxu0 %v3002_v46 }
 0x2cc   :  { %2743 = vmatprep.subr.bf16.mxu0 %v2840_v45 }
 0x2cf   :  { %2745 = vmatpush3.bf16.msra.mxu0 %v3009_v48  ;;  %v3265_v28 = vpop.f32.mrb[30].mxu1 }
 0x2d0   :  { %v1829_v29 = vsel %vm1828_vm5, %v3265_v28, 0.0  ;;  %v2470_v59 = vpop.f32.mrb[31].mxu1 }
 0x2d2   :  { %2504 = vmatmul.mubr.f32.vlgmr.msra.gmra.mrb[30].mxu0 %v1516_v5 }
 0x345   :  { %v3249_v46 = vpop.f32.mrb[24].mxu0 }
 0x346   :  { %v3251_v18 = vpop.f32.mrb[25].mxu0  ;;  %v1595_v48 = vsel %vm3241_vm2, %v3249_v46, 0.0 }
 0x347   :  { %v1602_v12 = vsel %vm1598_vm3, %v1595_v48, 0.0  ;;  %v1594_v21 = vsel %vm3245_vm4, %v3251_v18, 0.0 }
 0x348   :  { %1603 = vadd.xlane.f32.xlu0 %v1602_v12  ;;  %v1599_v22 = vsel %vm1598_vm3, %v1594_v21, 0.0 }
 0x349   :  { %1600 = vadd.xlane.f32.xlu1 %v1599_v22  ;;  %v1621_v23 = vadd.f32 %v1602_v12, %v1599_v22  ;;  %v1674_v12 = vmul.f32 2.0, %v3249_v46 }
 0x34b   :  { %v1622_v26 = vrot.slane %v1621_v23, 4 }
 0x34d   :  { %1830 = vadd.xlane.f32.xlu1 %v1829_v29  ;;  %v1623_v25 = vadd.f32 %v1622_v26, %v1621_v23 }
 0x34f   :  { %v1624_v58 = vrot.slane %v1623_v25, 2 }
 0x351   :  { %v1625_v49 = vadd.f32 %v1624_v58, %v1623_v25 }
 0x353   :  { %v1626_v34 = vrot.slane %v1625_v49, 1 }
 0x355   :  { %v1627_v51 = vadd.f32 %v1626_v34, %v1625_v49 }
 0x357   :  { %2762 = vrsqrt.f32 %v1627_v51  ;;  %vm1630_vm6 = vcmp.eq.f32.partialorder %v1627_v51, inf  ;;  %v1633_v57 = vand.u32 2147483648, %v1627_v51  ;;  %vm1632_vm8 = vcmp.eq.f32.partialorder %v1627_v51, 0.0 }
 0x361   :  { %v2763_v55 = vpop.eup %2762 }
 0x362   :  { %v1629_v52 = vmul.f32 %v2763_v55, %v1627_v51 }
 0x364   :  { %v1631_v56 = vsel %vm1630_vm6, %v1627_v51, %v1629_v52 }
 0x365   :  { %v3261_v13 = vpop.f32.mrb[26].mxu0  ;;  %v1634_v6 = vsel %vm1632_vm8, %v1633_v57, %v1631_v56 }
 0x366   :  { %v3263_v24 = vpop.f32.mrb[27].mxu0  ;;  %v1635_v15 = vmax.f32 %v1634_v6, 0.0001  ;;  %v1690_v22 = vmul.f32 2.0, %v3261_v13 }
 0x367   :  { %v1689_v29 = vmul.f32 2.0, %v3263_v24 }
 0x385   :  { %v3269_v30 = vpop.f32.mrb[28].mxu0 }
 0x386   :  { %v1597_v31 = vsel %vm3241_vm2, %v3269_v30, 0.0  ;;  %v3274_v32 = vpop.f32.mrb[29].mxu0 }
 0x387   :  { %v3277_v19 = vsel %vm1598_vm3, %v1597_v31, 0.0  ;;  %v1596_v20 = vsel %vm3245_vm4, %v3274_v32, 0.0 }
 0x388   :  { %v3283_v35 = vsel %vm1598_vm3, %v1596_v20, 0.0  ;;  %v1673_v20 = vmul.f32 2.0, %v3251_v18 }
 0x389   :  { %v1658_v60 = vadd.f32 %v3277_v19, %v3283_v35 }
 0x38b   :  { %v1659_v27 = vrot.slane %v1658_v60, 4 }
 0x38d   :  { %v1660_v41 = vadd.f32 %v1659_v27, %v1658_v60 }
 0x38f   :  { %v1661_v43 = vrot.slane %v1660_v41, 2 }
 0x391   :  { %v1662_v33 = vadd.f32 %v1661_v43, %v1660_v41 }
 0x393   :  { %v1663_v50 = vrot.slane %v1662_v33, 1 }
 0x395   :  { %v1664_v45 = vadd.f32 %v1663_v50, %v1662_v33 }
 0x397   :  { %2764 = vrsqrt.f32 %v1664_v45  ;;  %vm1667_vm7 = vcmp.eq.f32.partialorder %v1664_v45, inf  ;;  %v1670_v62 = vand.u32 2147483648, %v1664_v45  ;;  %vm1669_vm9 = vcmp.eq.f32.partialorder %v1664_v45, 0.0 }
 0x3a1   :  { %v2765_v9 = vpop.eup %2764 }
 0x3a2   :  { %v1666_v53 = vmul.f32 %v2765_v9, %v1664_v45 }
 0x3a4   :  { %v1668_v61 = vsel %vm1667_vm7, %v1664_v45, %v1666_v53 }
 0x3a5   :  { %v3287_v37 = vpop.f32.mrb[30].mxu0  ;;  %v1671_v3 = vsel %vm1669_vm9, %v1670_v62, %v1668_v61 }
 0x3a6   :  { %v2505_v39 = vpop.f32.mrb[31].mxu0  ;;  %v3289_v16 = vmax.f32 %v1671_v3, 0.0001  ;;  %v1842_v49 = vsel %vm1828_vm5, %v3287_v37, 0.0 }
 0x3d5   :  { %v1604_v47 = vpop.xlane.xlu0 %1603 }
 0x3d6   :  { %2766 = vrsqrt.f32 %v1604_v47  ;;  %v1601_v54 = vpop.xlane.xlu1 %1600  ;;  %vm1614_vm10 = vcmp.eq.f32.partialorder %v1604_v47, inf  ;;  %v1617_v0 = vand.u32 2147483648, %v1604_v47  ;;  %vm1616_vm11 = vcmp.eq.f32.partialorder %v1604_v47, 0.0 }
 0x3d7   :  { %2768 = vrsqrt.f32 %v1601_v54  ;;  %vm1607_vm12 = vcmp.eq.f32.partialorder %v1601_v54, inf  ;;  %v1610_v8 = vand.u32 2147483648, %v1601_v54  ;;  %vm1609_vm13 = vcmp.eq.f32.partialorder %v1601_v54, 0.0 }
 0x3e0   :  { %v2767_v4 = vpop.eup %2766 }
 0x3e1   :  { %v2769_v63 = vpop.eup %2768  ;;  %v1613_v2 = vmul.f32 %v2767_v4, %v1604_v47 }
 0x3e2   :  { %v1606_v1 = vmul.f32 %v2769_v63, %v1601_v54 }
 0x3e3   :  { %v1615_v7 = vsel %vm1614_vm10, %v1604_v47, %v1613_v2 }
 0x3e4   :  { %v1618_v10 = vsel %vm1616_vm11, %v1617_v0, %v1615_v7  ;;  %v1608_v11 = vsel %vm1607_vm12, %v1601_v54, %v1606_v1 }
 0x3e5   :  { %v1620_v14 = vmax.f32 %v1618_v10, 0.0001  ;;  %v1611_v5 = vsel %vm1609_vm13, %v1610_v8, %v1608_v11 }
 0x3e6   :  { %v1619_v36 = vmax.f32 %v1611_v5, 0.0001 }
 0x3e7   :  { %v1676_v38 = vmul.f32 %v1635_v15, %v1620_v14  ;;  %v1692_v40 = vmul.f32 %v3289_v16, %v1620_v14 }
 0x3e8   :  { %v1691_v17 = vmul.f32 %v3289_v16, %v1619_v36  ;;  %v1675_v48 = vmul.f32 %v1635_v15, %v1619_v36 }
 0x3e9   :  { %2770 = vrcp.f32 %v1676_v38 }
 0x3ea   :  { %2772 = vrcp.f32 %v1692_v40 }
 0x3eb   :  { %2774 = vrcp.f32 %v1691_v17 }
 0x3ec   :  { %2776 = vrcp.f32 %v1675_v48 }
 0x3f3   :  { %v2771_v21 = vpop.eup %2770 }
 0x3f4   :  { %v2773_v23 = vpop.eup %2772  ;;  %v1680_v59 = vmul.f32 %v2771_v21, %v1674_v12 }
 0x3f5   :  { %v2775_v31 = vpop.eup %2774  ;;  %v3297_v60 = vmul.f32 %v2773_v23, %v1690_v22 }
 0x3f6   :  { %v2777_v39 = vpop.eup %2776  ;;  %v3299_v26 = vmul.f32 %v2775_v31, %v1689_v29  ;;  %v3327_v50 = vsel %vm3241_vm2, -1e+30, %v1680_v59  ;;  %v1681_v59 = vmul.f32 2.0, %v3274_v32 }
 0x3f7   :  { %v1799_v27 = vsel %vm3241_vm2, %v3297_v60, 0.0  ;;  %v1678_v46 = vmul.f32 %v2777_v39, %v1673_v20  ;;  %v1710_v13 = vsel %vm1598_vm3, %v3297_v60, -inf  ;;  %v1704_v51 = vsel %vm1598_vm3, %v3327_v50, -inf }
 0x3f8   :  { %v1798_v24 = vsel %vm3245_vm4, %v3299_v26, 0.0  ;;  %v1801_v25 = vsel %vm1598_vm3, %v1799_v27, 0.0  ;;  %v1707_v18 = vsel %vm1598_vm3, %v3299_v26, -inf  ;;  %v1682_v27 = vmul.f32 2.0, %v3269_v30 }
 0x3f9   :  { %v1800_v41 = vsel %vm1598_vm3, %v1798_v24, 0.0  ;;  %v3313_v58 = vmax.f32 %v1707_v18, %v1710_v13  ;;  %v3321_v33 = vsel %vm3245_vm4, -1e+30, %v1678_v46 }
 0x3fa   :  { %v1802_v43 = vadd.f32 %v1801_v25, %v1800_v41  ;;  %v1701_v34 = vsel %vm1598_vm3, %v3321_v33, -inf }
 0x3fb   :  { %v1757_v20 = vrot.slane %v3313_v58, 4 }
 0x3fc   :  { %1803 = vadd.xlane.f32.xlu1 %v1802_v43 }
 0x400   :  { %1843 = vadd.xlane.f32.xlu1 %v1842_v49 }
 0x404   :  { %1637 = vadd.xlane.f32.xlu1 %v3283_v35  ;;  %v1831_v35 = vpop.xlane.xlu1 %1830 }
 0x408   :  { %1640 = vadd.xlane.f32.xlu1 %v3277_v19  ;;  %v1832_v19 = vrot.slane %v1831_v35, 4 }
 0x40a   :  { %v1833_v45 = vadd.f32 %v1832_v19, %v1831_v35 }
 0x40c   :  { %1702 = vmax.xlane.f32.xlu1 %v1701_v34  ;;  %v1834_v54 = vrot.slane %v1833_v45, 2 }
 0x40e   :  { %v1835_v57 = vadd.f32 %v1834_v54, %v1833_v45 }
 0x410   :  { %1705 = vmax.xlane.f32.xlu1 %v1704_v51  ;;  %v1836_v2 = vrot.slane %v1835_v57, 1 }
 0x412   :  { %v1837_v7 = vadd.f32 %v1836_v2, %v1835_v57 }
 0x414   :  { %1708 = vmax.xlane.f32.xlu1 %v1707_v18 }
 0x418   :  { %1711 = vmax.xlane.f32.xlu1 %v1710_v13  ;;  %v1758_v13 = vmax.f32 %v3313_v58, %v1757_v20 }
 0x41a   :  { %v1759_v41 = vrot.slane %v1758_v13, 2 }
 0x41c   :  { %v1760_v34 = vmax.f32 %v1758_v13, %v1759_v41 }
 0x41e   :  { %v1761_v35 = vrot.slane %v1760_v34, 1 }
 0x420   :  { %v1762_v45 = vmax.f32 %v1760_v34, %v1761_v35 }
 0x489   :  { %v1804_v47 = vpop.xlane.xlu1 %1803 }
 0x48a   :  { %v1805_v55 = vrot.slane %v1804_v47, 4 }
 0x48c   :  { %v1806_v9 = vadd.f32 %v1805_v55, %v1804_v47 }
 0x48d   :  { %v1844_v52 = vpop.xlane.xlu1 %1843 }
 0x48e   :  { %v1807_v53 = vrot.slane %v1806_v9, 2  ;;  %v1845_v56 = vrot.slane %v1844_v52, 4 }
 0x490   :  { %v1846_v61 = vadd.f32 %v1845_v56, %v1844_v52  ;;  %v1808_v4 = vadd.f32 %v1807_v53, %v1806_v9 }
 0x491   :  { %v1638_v62 = vpop.xlane.xlu1 %1637 }
 0x492   :  { %v1847_v63 = vrot.slane %v1846_v61, 2  ;;  %2778 = vrsqrt.f32 %v1638_v62  ;;  %v1809_v6 = vrot.slane %v1808_v4, 1  ;;  %vm1644_vm14 = vcmp.eq.f32.partialorder %v1638_v62, inf }
 0x493   :  { %v1647_v15 = vand.u32 2147483648, %v1638_v62  ;;  %vm1646_vm15 = vcmp.eq.f32.partialorder %v1638_v62, 0.0 }
 0x494   :  { %v1848_v0 = vadd.f32 %v1847_v63, %v1846_v61  ;;  %v1810_v1 = vadd.f32 %v1809_v6, %v1808_v4 }
 0x495   :  { %v1641_v3 = vpop.xlane.xlu1 %1640 }
 0x496   :  { %2780 = vrsqrt.f32 %v1641_v3  ;;  %2748 = vpush %v1810_v1  ;;  %v1849_v8 = vrot.slane %v1848_v0, 1  ;;  %vm1651_vm0 = vcmp.eq.f32.partialorder %v1641_v3, inf  ;;  %v1654_v48 = vand.u32 2147483648, %v1641_v3 }
 0x497   :  { %2750 = vpush %v1837_v7  ;;  %vm1653_vm1 = vcmp.eq.f32.partialorder %v1641_v3, 0.0 }
 0x498   :  { %v1850_v10 = vadd.f32 %v1849_v8, %v1848_v0 }
 0x499   :  { %v1703_v54 = vpop.xlane.xlu1 %1702 }
 0x49a   :  { %2752 = vpush %v1850_v10 }
 0x49c   :  { %v2779_v11 = vpop.eup %2778 }
 0x49d   :  { %v1643_v14 = vmul.f32 %v2779_v11, %v1638_v62 }
 0x49f   :  { %v1645_v5 = vsel %vm1644_vm14, %v1638_v62, %v1643_v14  ;;  %v1706_v62 = vpop.xlane.xlu1 %1705 }
 0x4a0   :  { %v2781_v36 = vpop.eup %2780  ;;  %v1648_v38 = vsel %vm1646_vm15, %v1647_v15, %v1645_v5 }
 0x4a1   :  { %v1656_v40 = vmax.f32 %v1648_v38, 0.0001  ;;  %v1650_v17 = vmul.f32 %v2781_v36, %v1641_v3 }
 0x4a3   :  { %v1683_v12 = vmul.f32 %v3289_v16, %v1656_v40  ;;  %v1652_v21 = vsel %vm1651_vm0, %v1641_v3, %v1650_v17  ;;  %v1709_v2 = vpop.xlane.xlu1 %1708 }
 0x4a4   :  { %v1655_v22 = vsel %vm1653_vm1, %v1654_v48, %v1652_v21  ;;  %v3355_v10 = vmax.f32 %v1703_v54, %v1709_v2 }
 0x4a5   :  { %2782 = vrcp.f32 %v1683_v12  ;;  %v1657_v23 = vmax.f32 %v1655_v22, 0.0001 }
 0x4a6   :  { %v1715_v12 = vsub.f32 %v3321_v33, %v3355_v10  ;;  %v1727_v13 = vsub.f32 %v3299_v26, %v3355_v10 }
 0x4a7   :  { %v1684_v29 = vmul.f32 %v3289_v16, %v1657_v23  ;;  %v1712_v15 = vpop.xlane.xlu1 %1711 }
 0x4a8   :  { %v3363_v21 = vmax.f32 %v1706_v62, %v1712_v15 }
 0x4a9   :  { %2784 = vrcp.f32 %v1684_v29 }
 0x4aa   :  { %v1716_v20 = vsub.f32 %v3327_v50, %v3363_v21  ;;  %v1728_v50 = vsub.f32 %v3297_v60, %v3363_v21 }
 0x4af   :  { %v2783_v31 = vpop.eup %2782 }
 0x4b0   :  { %v1686_v39 = vmul.f32 %v2783_v31, %v1681_v59  ;;  %v1717_v31 = vmul.f32 1.442695, %v1715_v12 }
 0x4b2   :  { %v1699_v25 = vsel %vm3245_vm4, -1e+30, %v1686_v39 }
 0x4b3   :  { %v2785_v46 = vpop.eup %2784  ;;  %v1747_v16 = vsel %vm1598_vm3, %v1699_v25, -inf }
 0x4b4   :  { %v1688_v24 = vmul.f32 %v2785_v46, %v1682_v27 }
 0x4b6   :  { %v1700_v18 = vsel %vm3241_vm2, -1e+30, %v1688_v24 }
 0x4b7   :  { %v1748_v32 = vsel %vm1598_vm3, %v1700_v18, -inf }
 0x4b8   :  { %v1749_v43 = vmax.f32 %v1747_v16, %v1748_v32 }
 0x4ba   :  { %v1750_v49 = vrot.slane %v1749_v43, 4 }
 0x4bc   :  { %v1751_v51 = vmax.f32 %v1749_v43, %v1750_v49  ;;  %v1729_v49 = vmul.f32 1.442695, %v1727_v13 }
 0x4be   :  { %v1752_v30 = vrot.slane %v1751_v51, 2 }
 0x4c0   :  { %v1753_v19 = vmax.f32 %v1751_v51, %v1752_v30 }
 0x4c2   :  { %v1754_v58 = vrot.slane %v1753_v19, 1 }
 0x4c4   :  { %v1755_v47 = vmax.f32 %v1753_v19, %v1754_v58  ;;  %v1731_v58 = vmul.f32 1.442695, %v1728_v50 }
 0x4c6   :  { %v3343_v44 = vmax.f32 %v1755_v47, %v1762_v45 }
 0x4c7   :  { %s3345_s3 = spop %2748 }
 0x4c8   :  { %v1764_v42 = vsub.f32 %v1699_v25, %v3343_v44  ;;  %v1765_v55 = vsub.f32 %v1700_v18, %v3343_v44  ;;  %v1779_v9 = vsub.f32 %v3299_v26, %v3343_v44  ;;  %v1780_v52 = vsub.f32 %v3297_v60, %v3343_v44  ;;  %s2751_s23 = spop %2750 }
 0x4c9   :  { %v1839_v53 = vstv %s2751_s23  ;;  %v1719_v25 = vmul.f32 1.442695, %v1716_v20 }
 0x4ca   :  { %v1766_v56 = vmul.f32 1.442695, %v1764_v42  ;;  %v1768_v57 = vmul.f32 1.442695, %v1765_v55  ;;  %2786 = vrcp.f32 %v1839_v53  ;;  %v1781_v61 = vmul.f32 1.442695, %v1779_v9 }
 0x4cb   :  { %s2753_s24 = spop %2752  ;;  %v1783_v4 = vmul.f32 1.442695, %v1780_v52 }
 0x4cc   :  { %2788 = vpow2.f32 %v1766_v56  ;;  %v1852_v63 = vstv %s2753_s24 }
 0x4cd   :  { %2790 = vpow2.f32 %v1768_v57 }
 0x4ce   :  { %2792 = vrcp.f32 %v1852_v63 }
 0x4cf   :  { %2794 = vpow2.f32 %v1781_v61 }
 0x4d0   :  { %2796 = vpow2.f32 %v1783_v4 }
 0x4d4   :  { %v2787_v6 = vpop.eup %2786 }
 0x4d5   :  { %v1841_v3 = vmul.f32 %v2787_v6, %v3265_v28 }
 0x4d6   :  { %v2789_v0 = vpop.eup %2788 }
 0x4d7   :  { %v2791_v1 = vpop.eup %2790  ;;  %v1770_v7 = vsel %vm1598_vm3, %v2789_v0, 0.0  ;;  %vm1855_vm2 = vcmp.gt.f32.partialorder %v1841_v3, 0.0 }
 0x4d8   :  { %v2793_v8 = vpop.eup %2792  ;;  %v1771_v11 = vsel %vm1598_vm3, %v2791_v1, 0.0  ;;  %v1856_v5 = vsel %vm1855_vm2, %v1841_v3, 1.0 }
 0x4d9   :  { %v2795_v14 = vpop.eup %2794  ;;  %v1854_v36 = vmul.f32 %v2793_v8, %v3287_v37  ;;  %v1772_v38 = vadd.f32 %v1771_v11, %v1770_v7  ;;  %2798 = vlog2.f32 %v1856_v5 }
 0x4da   :  { %v2797_v40 = vpop.eup %2796  ;;  %v1785_v17 = vsel %vm1598_vm3, %v2795_v14, 0.0 }
 0x4db   :  { %vm1872_vm4 = vcmp.gt.f32.partialorder %v1854_v36, 0.0  ;;  %v1773_v28 = vrot.slane %v1772_v38, 4  ;;  %v1786_v48 = vsel %vm1598_vm3, %v2797_v40, 0.0 }
 0x4dc   :  { %v1873_v22 = vsel %vm1872_vm4, %v1854_v36, 1.0  ;;  %v1787_v23 = vadd.f32 %v1786_v48, %v1785_v17 }
 0x4dd   :  { %2800 = vlog2.f32 %v1873_v22  ;;  %v1774_v29 = vadd.f32 %v1773_v28, %v1772_v38 }
 0x4de   :  { %v1788_v59 = vrot.slane %v1787_v23, 4  ;;  %2802 = vpow2.f32 %v1717_v31 }
 0x4df   :  { %v1775_v37 = vrot.slane %v1774_v29, 2  ;;  %2804 = vpow2.f32 %v1719_v25 }
 0x4e0   :  { %v1789_v39 = vadd.f32 %v1788_v59, %v1787_v23  ;;  %2806 = vpow2.f32 %v1729_v49 }
 0x4e1   :  { %v1776_v27 = vadd.f32 %v1775_v37, %v1774_v29 }
 0x4e2   :  { %v1790_v46 = vrot.slane %v1789_v39, 2 }
 0x4e3   :  { %v1777_v24 = vrot.slane %v1776_v27, 1  ;;  %v2799_v33 = vpop.eup %2798 }
 0x4e4   :  { %v1791_v18 = vadd.f32 %v1790_v46, %v1789_v39  ;;  %v1858_v16 = vmul.f32 0.6931472, %v2799_v33  ;;  %v1812_v33 = vstv %s3345_s3 }
 0x4e5   :  { %v1778_v32 = vadd.f32 %v1777_v24, %v1776_v27 }
 0x4e6   :  { %v1792_v41 = vrot.slane %v1791_v18, 1  ;;  %v1859_v34 = vmul.f32 %v1858_v16, %v1841_v3  ;;  %v1813_v16 = vmul.f32 2.0, %v1812_v33 }
 0x4e7   :  { %v2801_v43 = vpop.eup %2800 }
 0x4e8   :  { %v1875_v51 = vmul.f32 0.6931472, %v2801_v43  ;;  %v1793_v30 = vadd.f32 %v1792_v41, %v1791_v18  ;;  %v1860_v35 = vsel %vm1828_vm5, %v1859_v34, 0.0  ;;  %v2803_v47 = vpop.eup %2802 }
 0x4e9   :  { %1861 = vadd.xlane.f32.xlu1 %v1860_v35  ;;  %v1721_v54 = vsel %vm1598_vm3, %v2803_v47, 0.0  ;;  %v2805_v42 = vpop.eup %2804 }
 0x4ea   :  { %v1876_v26 = vmul.f32 %v1875_v51, %v1854_v36  ;;  %v1794_v19 = vadd.f32 %v1793_v30, %v1778_v32  ;;  %v2807_v60 = vpop.eup %2806  ;;  %v1724_v55 = vsel %vm1598_vm3, %v2805_v42, 0.0 }
 0x4eb   :  { %v1733_v53 = vsel %vm1598_vm3, %v2807_v60, 0.0 }
 0x4ec   :  { %v1877_v45 = vsel %vm1828_vm5, %v1876_v26, 0.0  ;;  %2808 = vlog2.f32 %v1794_v19 }
 0x4ed   :  { %1878 = vadd.xlane.f32.xlu1 %v1877_v45  ;;  %2810 = vpow2.f32 %v1731_v58 }
 0x4f1   :  { %1722 = vadd.xlane.f32.xlu1 %v1721_v54 }
 0x4f5   :  { %1725 = vadd.xlane.f32.xlu1 %v1724_v55 }
 0x4f6   :  { %v2809_v9 = vpop.eup %2808 }
 0x4f7   :  { %v1796_v52 = vmul.f32 0.6931472, %v2809_v9  ;;  %v2811_v57 = vpop.eup %2810 }
 0x4f8   :  { %v1736_v61 = vsel %vm1598_vm3, %v2811_v57, 0.0 }
 0x4f9   :  { %v1797_v56 = vadd.f32 %v1796_v52, %v3343_v44  ;;  %1734 = vadd.xlane.f32.xlu1 %v1733_v53 }
 0x4fb   :  { %v1821_v4 = vsel %vm1598_vm3, %v1797_v56, 0.0  ;;  %vm1891_vm3 = vcmask 0  }
 0x4fd   :  { %1737 = vadd.xlane.f32.xlu1 %v1736_v61 }
 0x501   :  { %1822 = vadd.xlane.f32.xlu1 %v1821_v4 }
 0x576   :  { %v1862_v62 = vpop.xlane.xlu1 %1861 }
 0x577   :  { %v1863_v63 = vrot.slane %v1862_v62, 4 }
 0x579   :  { %v1864_v2 = vadd.f32 %v1863_v63, %v1862_v62 }
 0x57a   :  { %v1879_v6 = vpop.xlane.xlu1 %1878 }
 0x57b   :  { %v1865_v0 = vrot.slane %v1864_v2, 2  ;;  %v1880_v3 = vrot.slane %v1879_v6, 4 }
 0x57d   :  { %v1881_v1 = vadd.f32 %v1880_v3, %v1879_v6  ;;  %v1866_v7 = vadd.f32 %v1865_v0, %v1864_v2 }
 0x57e   :  { %v1723_v8 = vpop.xlane.xlu1 %1722 }
 0x57f   :  { %v1882_v11 = vrot.slane %v1881_v1, 2  ;;  %v1867_v14 = vrot.slane %v1866_v7, 1 }
 0x581   :  { %v1868_v44 = vadd.f32 %v1867_v14, %v1866_v7  ;;  %v1883_v15 = vadd.f32 %v1882_v11, %v1881_v1 }
 0x582   :  { %v1726_v5 = vpop.xlane.xlu1 %1725 }
 0x583   :  { %2754 = vpush %v1868_v44  ;;  %v1884_v36 = vrot.slane %v1883_v15, 1 }
 0x585   :  { %v1885_v38 = vadd.f32 %v1884_v36, %v1883_v15 }
 0x586   :  { %v1735_v40 = vpop.xlane.xlu1 %1734 }
 0x587   :  { %v1739_v17 = vadd.f32 %v1735_v40, %v1723_v8  ;;  %2756 = vpush %v1885_v38 }
 0x589   :  { %2812 = vlog2.f32 %v1739_v17 }
 0x58a   :  { %v1738_v28 = vpop.xlane.xlu1 %1737 }
 0x58b   :  { %v1740_v48 = vadd.f32 %v1738_v28, %v1726_v5 }
 0x58d   :  { %2814 = vlog2.f32 %v1740_v48 }
 0x58e   :  { %v1823_v25 = vpop.xlane.xlu1 %1822 }
 0x593   :  { %v2813_v12 = vpop.eup %2812 }
 0x594   :  { %v1742_v22 = vmul.f32 0.6931472, %v2813_v12 }
 0x596   :  { %v1745_v59 = vadd.f32 %v1742_v22, %v3355_v10 }
 0x597   :  { %v2815_v23 = vpop.eup %2814 }
 0x598   :  { %v1744_v29 = vmul.f32 0.6931472, %v2815_v23 }
 0x59a   :  { %v1746_v37 = vadd.f32 %v1744_v29, %v3363_v21 }
 0x59c   :  { %v1814_v31 = vadd.f32 %v1746_v37, %v1745_v59 }
 0x59e   :  { %v1815_v20 = vrot.slane %v1814_v31, 4 }
 0x5a0   :  { %v1816_v39 = vadd.f32 %v1815_v20, %v1814_v31 }
 0x5a2   :  { %v1817_v27 = vrot.slane %v1816_v39, 2 }
 0x5a4   :  { %v1818_v46 = vadd.f32 %v1817_v27, %v1816_v39 }
 0x5a6   :  { %v1819_v13 = vrot.slane %v1818_v46, 1 }
 0x5a8   :  { %v1820_v24 = vadd.f32 %v1819_v13, %v1818_v46 }
 0x5aa   :  { %v1824_v18 = vadd.f32 %v1823_v25, %v1820_v24 }
 0x5ac   :  { %v1825_v32 = vsub.f32 %v1824_v18, %v1813_v16 }
 0x5ae   :  { %v1827_v49 = vmul.f32 0.03125, %v1825_v32 }
 0x5b4   :  { %s2755_s25 = spop %2754 }
 0x5b5   :  { %v1870_v41 = vstv %s2755_s25 }
 0x5b6   :  { %v1871_v43 = vadd.f32 2.7725887, %v1870_v41 }
 0x5b8   :  { %s2757_s26 = spop %2756  ;;  %v1889_v21 = vadd.f32 %v1871_v43, %v1827_v49 }
 0x5b9   :  { %v1887_v10 = vstv %s2757_s26 }
 0x5ba   :  { %v1888_v34 = vadd.f32 2.7725887, %v1887_v10 }
 0x5bc   :  { %v1890_v50 = vadd.f32 %v1889_v21, %v1888_v34 }
 0x5be   :  { %1892 = vst.msk [vmem:[#allocation7] sm:$0x1] %vm1891_vm3, %v1890_v50 }
 0x5bf   :  { %2827 = shalt.err (!%p2824_p4)
}
 0x5c0   :  { %s2828_s7 = scalar_lea.hbm %s3398_s4, 16 }
 0x5c1   :  { %p2829_p5 = scmp.ne.s32.totalorder %s3398_s4, %s2828_s7  ;;  %p2832_p6 = scmp.lt.u32.totalorder %s2828_s7, %s3398_s4 }
 0x5c3   :  { %p2834_p7 = pnand %p2832_p6, %p2829_p5 }
 0x5c5   :  { %2837 = shalt.err (!%p2834_p7)
}
 0x5c6   :  { %1902 = dma.vmem_to_hbm [thread:$0]  %s1900_s28, 16, %s3398_s4, [#allocation8]  }
 0x5c7   :  { %2838 = dma.done.wait [#allocation8], 16  }
 0x5c8   :  { %2839 = vsyncadd [#allocation8], 4294967280 }
 0x5c9   :  { %1906 = vsyncpa [#allocation8], 1 }

</bundles_post_ra>
